<compile_context>
chip_gen: v7x
topology: tpu7x:2x2x1
jax: 0.10.0
libtpu: 0.0.40
codegen_flags: <defaults>
</compile_context>

<pallas_src>
import functools
import math

import jax
import jax.numpy as jnp
from jax.experimental import pallas as pl
from jax.experimental.pallas import tpu as pltpu


# ----------------------------------------------------------------------------
# One-time weight transform: conv2d -> dense matrix (NCHW flatten both sides)
# ----------------------------------------------------------------------------
def _conv_to_dense(w_oihw, bias, C, H, W, stride, pad):
    """Return (D, b_flat, OC, OH, OW) such that for x of shape (B, C, H, W):
         conv2d(x, w, stride, pad).reshape(B, -1) == x.reshape(B, -1) @ D + b_flat
       with torch-style NCHW flatten ordering on both sides."""
    n_in = C * H * W
    eye = jnp.eye(n_in, dtype=jnp.float32).reshape(n_in, C, H, W)
    y = jax.lax.conv_general_dilated(
        eye, w_oihw, (stride, stride), [(pad, pad), (pad, pad)],
        dimension_numbers=("NCHW", "OIHW", "NCHW"))
    OC, OH, OW = int(y.shape[1]), int(y.shape[2]), int(y.shape[3])
    dense = y.reshape(n_in, OC * OH * OW)
    b_flat = jnp.repeat(bias, OH * OW)          # oc-major, matches NCHW flatten
    return dense, b_flat, OC, OH, OW


# ----------------------------------------------------------------------------
# The single fused Pallas kernel
# ----------------------------------------------------------------------------
def _fused_policy_kernel(*refs, n_conv, n_main, n_aux, cil, added, out_n, two_n):
    it = iter(refs)
    x_ref = next(it)
    conv_wb = [(next(it), next(it)) for _ in range(n_conv)]
    wm0_conv = next(it)
    wm0_extra = next(it) if added else None
    bm0 = next(it)
    main_rest = [(next(it), next(it)) for _ in range(n_main - 1)]
    aux_wb = [(next(it), next(it)) for _ in range(n_aux)]
    la_w, la_b = next(it), next(it)
    hd_w, hd_b = next(it), next(it)
    out_ref = next(it)

    # ---- conv stack: dense matmuls on NCHW-flattened features (bf16 MXU, f32 acc)
    h = x_ref[:, :cil].astype(jnp.bfloat16)
    for w_ref, b_ref in conv_wb:
        z = jnp.dot(h, w_ref[...], preferred_element_type=jnp.float32) + b_ref[...]
        h = jnp.maximum(z, 0.0).astype(jnp.bfloat16)
    # h: (bm, conv_flat) bf16, already in torch's .view(B, -1) order

    # ---- main branch (first layer splits conv-features / extra-fc-input weights)
    zm = jnp.dot(h, wm0_conv[...], preferred_element_type=jnp.float32)
    if added:
        extra = x_ref[:, cil:cil + added].astype(jnp.bfloat16)
        zm = zm + jnp.dot(extra, wm0_extra[...], preferred_element_type=jnp.float32)
    hm = jnp.maximum(zm + bm0[...], 0.0).astype(jnp.bfloat16)
    for w_ref, b_ref in main_rest:
        hm = jnp.maximum(
            jnp.dot(hm, w_ref[...], preferred_element_type=jnp.float32) + b_ref[...],
            0.0).astype(jnp.bfloat16)

    # ---- aux branch (conv features only)
    ha = h
    for w_ref, b_ref in aux_wb:
        ha = jnp.maximum(
            jnp.dot(ha, w_ref[...], preferred_element_type=jnp.float32) + b_ref[...],
            0.0).astype(jnp.bfloat16)
    za = jnp.dot(ha, la_w[...], preferred_element_type=jnp.float32) + la_b[...]
    h_aux = pl.reciprocal(1.0 + jnp.exp(-za), approx=True)   # sigmoid, divide on EUP

    # ---- fused mean / log_std heads: one (K, 2N) matmul
    y = jnp.dot(hm, hd_w[...], preferred_element_type=jnp.float32) + hd_b[...]
    col = jax.lax.broadcasted_iota(jnp.int32, y.shape, 1)
    std = jnp.exp(jnp.clip(y, -20.0, 2.0))
    heads = jnp.where(col < out_n, y, std)      # cols [0,N) = mean, [N,2N) = std

    # ---- single lane-dense packed output:  [ mean | std | h_aux ]
    out_ref[:, :two_n] = heads
    out_ref[:, two_n:] = h_aux


# ----------------------------------------------------------------------------
# Canonical (torch-style) parameters
# ----------------------------------------------------------------------------
def make_params(key, cfg):
    p = {"conv_w": [], "conv_b": [], "fc_main_w": [], "fc_main_b": [],
         "fc_aux_w": [], "fc_aux_b": []}
    init_w = cfg["init_w"]

    def uniform(k, shape, bound):
        return jax.random.uniform(k, shape, jnp.float32, -bound, bound)

    c_in = cfg["input_channels"]
    H, W = cfg["input_height"], cfg["input_width"]
    for oc, k, s, pad in zip(cfg["n_channels"], cfg["kernel_sizes"],
                             cfg["strides"], cfg["paddings"]):
        key, sub = jax.random.split(key)
        fan_in, fan_out = c_in * k * k, oc * k * k
        bound = math.sqrt(6.0 / (fan_in + fan_out))           # xavier_uniform
        p["conv_w"].append(uniform(sub, (oc, c_in, k, k), bound))   # (OC,C,kh,kw)
        p["conv_b"].append(jnp.zeros((oc,), jnp.float32))
        c_in = oc
        H = (H + 2 * pad - k) // s + 1
        W = (W + 2 * pad - k) // s + 1
    conv_flat = c_in * H * W

    def fc_stack(key, in_size, hidden_sizes, wl, bl):
        for hs in hidden_sizes:
            key, k1, k2 = jax.random.split(key, 3)
            wl.append(uniform(k1, (in_size, hs), init_w))
            bl.append(uniform(k2, (hs,), init_w))
            in_size = hs
        return key, in_size

    key, main_last = fc_stack(key, conv_flat + cfg["added_fc_input_size"],
                              cfg["hidden_sizes_main"], p["fc_main_w"], p["fc_main_b"])
    key, aux_last = fc_stack(key, conv_flat, cfg["hidden_sizes_aux"],
                             p["fc_aux_w"], p["fc_aux_b"])

    key, k1, k2, k3, k4, k5, k6 = jax.random.split(key, 7)
    p["last_fc_main_w"] = uniform(k1, (main_last, cfg["output_size"]), init_w)
    p["last_fc_main_b"] = uniform(k2, (cfg["output_size"],), init_w)
    p["last_fc_aux_w"] = uniform(k3, (aux_last, cfg["aux_output_size"]), init_w)
    p["last_fc_aux_b"] = uniform(k4, (cfg["aux_output_size"],), init_w)
    # std is None in the reference config -> learned log_std head
    p["last_fc_log_std_w"] = uniform(k5, (main_last, cfg["output_size"]), init_w)
    p["last_fc_log_std_b"] = uniform(k6, (cfg["output_size"],), init_w)
    return p


# ----------------------------------------------------------------------------
# One-time transform: canonical params -> kernel argument tuple
# (conv -> dense bf16, FC weights bf16, f32 (1,N) biases, pre-concatenated heads)
# ----------------------------------------------------------------------------
def prepare_kernel_params(params, cfg):
    added = cfg["added_fc_input_size"]
    args = []
    c, h, w = cfg["input_channels"], cfg["input_height"], cfg["input_width"]
    for wc, bc, s, pad in zip(params["conv_w"], params["conv_b"],
                              cfg["strides"], cfg["paddings"]):
        dense, b_flat, c, h, w = _conv_to_dense(wc, bc, c, h, w, s, pad)
        args += [dense.astype(jnp.bfloat16), b_flat.reshape(1, -1)]
    conv_flat = c * h * w

    wm0 = params["fc_main_w"][0]
    args.append(wm0[:conv_flat].astype(jnp.bfloat16))
    if added:
        args.append(wm0[conv_flat:].astype(jnp.bfloat16))
    args.append(params["fc_main_b"][0].reshape(1, -1))
    for wi, bi in zip(params["fc_main_w"][1:], params["fc_main_b"][1:]):
        args += [wi.astype(jnp.bfloat16), bi.reshape(1, -1)]
    for wi, bi in zip(params["fc_aux_w"], params["fc_aux_b"]):
        args += [wi.astype(jnp.bfloat16), bi.reshape(1, -1)]
    args += [params["last_fc_aux_w"].astype(jnp.bfloat16),
             params["last_fc_aux_b"].reshape(1, -1)]
    hd_w = jnp.concatenate([params["last_fc_main_w"],
                            params["last_fc_log_std_w"]], axis=1)
    hd_b = jnp.concatenate([params["last_fc_main_b"],
                            params["last_fc_log_std_b"]], axis=0)
    args += [hd_w.astype(jnp.bfloat16), hd_b.reshape(1, -1)]
    return tuple(args)


# ----------------------------------------------------------------------------
# Forward builder (all static config closed over, never traced)
# ----------------------------------------------------------------------------
def build_forward(cfg):
    C, H, W = cfg["input_channels"], cfg["input_height"], cfg["input_width"]
    cil = C * H * W
    added = cfg["added_fc_input_size"]
    out_n = cfg["output_size"]
    aux_n = cfg["aux_output_size"]
    two_n = 2 * out_n
    total_out = two_n + aux_n
    n_conv = len(cfg["n_channels"])
    n_main = len(cfg["hidden_sizes_main"])
    n_aux = len(cfg["hidden_sizes_aux"])
    assert n_main >= 1 and n_aux >= 1

    kernel = functools.partial(
        _fused_policy_kernel, n_conv=n_conv, n_main=n_main, n_aux=n_aux,
        cil=cil, added=added, out_n=out_n, two_n=two_n)

    def forward(kparams, x):
        """Returns (mean, std, h_aux) — the tensors parameterizing (TanhNormal, h_aux)."""
        B, obs_dim = x.shape
        # Batch tile: keeps the VMEM footprint v7x-safe (64 MiB) and lets the
        # "parallel" grid axis shard the batch across both v7x TensorCores.
        bm_rows = B if B <= 256 else 256
        grid = (pl.cdiv(B, bm_rows),)

        in_specs = [pl.BlockSpec((bm_rows, obs_dim), lambda i: (i, 0))]
        in_specs += [pl.BlockSpec(a.shape, lambda i: (0, 0)) for a in kparams]

        packed = pl.pallas_call(
            kernel,
            out_shape=jax.ShapeDtypeStruct((B, total_out), jnp.float32),
            grid=grid,
            in_specs=in_specs,
            out_specs=pl.BlockSpec((bm_rows, total_out), lambda i: (i, 0)),
            compiler_params=pltpu.CompilerParams(
                dimension_semantics=("parallel",),
                vmem_limit_bytes=32 * 1024 * 1024),   # safe on v5e/v6e/v7x
        )(x, *kparams)

        mean = packed[:, :out_n]
        std = packed[:, out_n:two_n]
        h_aux = packed[:, two_n:]
        # TODO(synk): TanhNormal is a distribution object (no tensor op); callers
        # build it from (mean, std); torch.tanh(mean) is trivially jnp.tanh(mean).
        return mean, std, h_aux

    return forward


# ----------------------------------------------------------------------------
# Pure-JAX reference (f32) for a tolerance check
# ----------------------------------------------------------------------------
def reference_forward(params, x, cfg):
    C, H, W = cfg["input_channels"], cfg["input_height"], cfg["input_width"]
    cil = C * H * W
    B = x.shape[0]
    h = x[:, :cil].reshape(B, C, H, W)
    for w, b, s, p in zip(params["conv_w"], params["conv_b"],
                          cfg["strides"], cfg["paddings"]):
        h = jax.lax.conv_general_dilated(h, w, (s, s), [(p, p), (p, p)],
                                         dimension_numbers=("NCHW", "OIHW", "NCHW"))
        h = jnp.maximum(h + b.reshape(1, -1, 1, 1), 0.0)
    flat = h.reshape(B, -1)
    added = cfg["added_fc_input_size"]
    h_main = jnp.concatenate([flat, x[:, cil:cil + added]], axis=1) if added else flat
    for w, b in zip(params["fc_main_w"], params["fc_main_b"]):
        h_main = jnp.maximum(h_main @ w + b, 0.0)
    h_aux = flat
    for w, b in zip(params["fc_aux_w"], params["fc_aux_b"]):
        h_aux = jnp.maximum(h_aux @ w + b, 0.0)
    h_aux = jax.nn.sigmoid(h_aux @ params["last_fc_aux_w"] + params["last_fc_aux_b"])
    mean = h_main @ params["last_fc_main_w"] + params["last_fc_main_b"]
    log_std = jnp.clip(h_main @ params["last_fc_log_std_w"]
                       + params["last_fc_log_std_b"], -20.0, 2.0)
    return mean, jnp.exp(log_std), h_aux


# ----------------------------------------------------------------------------
# Demo
# ----------------------------------------------------------------------------
if __name__ == "__main__":
    cfg = dict(
        input_width=16, input_height=16, input_channels=4, output_size=6,
        kernel_sizes=[3, 3], n_channels=[8, 8], strides=[2, 2], paddings=[1, 1],
        hidden_sizes_main=[32, 32], hidden_sizes_aux=[32],
        added_fc_input_size=3, aux_output_size=1, init_w=1e-4,
    )
    B = 2

    key = jax.random.PRNGKey(0)
    key, pkey, xkey = jax.random.split(key, 3)
    params = make_params(pkey, cfg)
    kparams = prepare_kernel_params(params, cfg)        # one-time weight transform

    obs_dim = (cfg["input_width"] * cfg["input_height"] * cfg["input_channels"]
               + cfg["added_fc_input_size"])
    x = jax.random.normal(xkey, (B, obs_dim), jnp.float32)

    forward = jax.jit(build_forward(cfg))
    mean, std, h_aux = forward(kparams, x)
    jax.block_until_ready((mean, std, h_aux))

    assert mean.shape == (B, cfg["output_size"])
    assert std.shape == (B, cfg["output_size"])
    assert h_aux.shape == (B, cfg["aux_output_size"])
    assert bool(jnp.all(std > 0)) and bool(jnp.all((h_aux >= 0) & (h_aux <= 1)))

    # correctness vs pure-JAX f32 reference (bf16 MXU inputs -> loose tolerance)
    mean_r, std_r, aux_r = reference_forward(params, x, cfg)
    assert bool(jnp.allclose(mean, mean_r, atol=2e-3, rtol=5e-2))
    assert bool(jnp.allclose(std, std_r, atol=2e-3, rtol=5e-2))
    assert bool(jnp.allclose(h_aux, aux_r, atol=2e-3, rtol=5e-2))

    print("KERNEL_OK")
</pallas_src>

<mosaic_0001>
module attributes {stable_mosaic.version = 11 : i64} {
  func.func @_fused_policy_kernel(%arg0: i32, %arg1: memref<2x1027xf32, #tpu.memory_space<vmem>>, %arg2: memref<1024x512xbf16, #tpu.memory_space<vmem>>, %arg3: memref<1x512xf32, #tpu.memory_space<vmem>>, %arg4: memref<512x128xbf16, #tpu.memory_space<vmem>>, %arg5: memref<1x128xf32, #tpu.memory_space<vmem>>, %arg6: memref<128x32xbf16, #tpu.memory_space<vmem>>, %arg7: memref<3x32xbf16, #tpu.memory_space<vmem>>, %arg8: memref<1x32xf32, #tpu.memory_space<vmem>>, %arg9: memref<32x32xbf16, #tpu.memory_space<vmem>>, %arg10: memref<1x32xf32, #tpu.memory_space<vmem>>, %arg11: memref<128x32xbf16, #tpu.memory_space<vmem>>, %arg12: memref<1x32xf32, #tpu.memory_space<vmem>>, %arg13: memref<32x1xbf16, #tpu.memory_space<vmem>>, %arg14: memref<1x1xf32, #tpu.memory_space<vmem>>, %arg15: memref<32x12xbf16, #tpu.memory_space<vmem>>, %arg16: memref<1x12xf32, #tpu.memory_space<vmem>>, %arg17: memref<2x13xf32, #tpu.memory_space<vmem>>) attributes {dimension_semantics = [#tpu.dimension_semantics<parallel>], iteration_bounds = array<i64: 1>, scalar_prefetch = 0 : i64, scratch_operands = 0 : i64, tpu.core_type = #tpu.core_type<tc>, window_params = [{transform_indices = @transform_0, window_bounds = array<i64: 2, 1027>}, {pipeline_mode = #tpu.pipeline_mode<synchronous>, transform_indices = @transform_1, window_bounds = array<i64: 1024, 512>}, {pipeline_mode = #tpu.pipeline_mode<synchronous>, transform_indices = @transform_2, window_bounds = array<i64: 1, 512>}, {pipeline_mode = #tpu.pipeline_mode<synchronous>, transform_indices = @transform_3, window_bounds = array<i64: 512, 128>}, {pipeline_mode = #tpu.pipeline_mode<synchronous>, transform_indices = @transform_4, window_bounds = array<i64: 1, 128>}, {pipeline_mode = #tpu.pipeline_mode<synchronous>, transform_indices = @transform_5, window_bounds = array<i64: 128, 32>}, {pipeline_mode = #tpu.pipeline_mode<synchronous>, transform_indices = @transform_6, window_bounds = array<i64: 3, 32>}, {pipeline_mode = #tpu.pipeline_mode<synchronous>, transform_indices = @transform_7, window_bounds = array<i64: 1, 32>}, {pipeline_mode = #tpu.pipeline_mode<synchronous>, transform_indices = @transform_8, window_bounds = array<i64: 32, 32>}, {pipeline_mode = #tpu.pipeline_mode<synchronous>, transform_indices = @transform_9, window_bounds = array<i64: 1, 32>}, {pipeline_mode = #tpu.pipeline_mode<synchronous>, transform_indices = @transform_10, window_bounds = array<i64: 128, 32>}, {pipeline_mode = #tpu.pipeline_mode<synchronous>, transform_indices = @transform_11, window_bounds = array<i64: 1, 32>}, {pipeline_mode = #tpu.pipeline_mode<synchronous>, transform_indices = @transform_12, window_bounds = array<i64: 32, 1>}, {pipeline_mode = #tpu.pipeline_mode<synchronous>, transform_indices = @transform_13, window_bounds = array<i64: 1, 1>}, {pipeline_mode = #tpu.pipeline_mode<synchronous>, transform_indices = @transform_14, window_bounds = array<i64: 32, 12>}, {pipeline_mode = #tpu.pipeline_mode<synchronous>, transform_indices = @transform_15, window_bounds = array<i64: 1, 12>}, {transform_indices = @transform_16, window_bounds = array<i64: 2, 13>}]} {
    %c0 = arith.constant 0 : index
    %c0_0 = arith.constant 0 : index
    %0 = vector.load %arg1[%c0, %c0_0] : memref<2x1027xf32, #tpu.memory_space<vmem>>, vector<2x1024xf32>
    %1 = arith.truncf %0 : vector<2x1024xf32> to vector<2x1024xbf16>
    %c0_1 = arith.constant 0 : index
    %c0_2 = arith.constant 0 : index
    %2 = vector.load %arg2[%c0_1, %c0_2] : memref<1024x512xbf16, #tpu.memory_space<vmem>>, vector<1024x512xbf16>
    %cst = arith.constant dense<0.000000e+00> : vector<2x512xf32>
    %3 = tpu.matmul %1, %2, %cst {dimension_numbers = #tpu.dot_dimension_numbers<[1], [0], [0], [1], [0, 0, 1, 1], [], []>} : vector<2x1024xbf16>, vector<1024x512xbf16>, vector<2x512xf32> -> vector<2x512xf32>
    %c0_3 = arith.constant 0 : index
    %c0_4 = arith.constant 0 : index
    %4 = vector.load %arg3[%c0_3, %c0_4] : memref<1x512xf32, #tpu.memory_space<vmem>>, vector<1x512xf32>
    %5 = vector.broadcast %4 : vector<1x512xf32> to vector<2x512xf32>
    %6 = arith.addf %3, %5 : vector<2x512xf32>
    %cst_5 = arith.constant 0.000000e+00 : f32
    %7 = vector.broadcast %cst_5 : f32 to vector<2x512xf32>
    %8 = arith.maximumf %6, %7 : vector<2x512xf32>
    %9 = arith.truncf %8 : vector<2x512xf32> to vector<2x512xbf16>
    %c0_6 = arith.constant 0 : index
    %c0_7 = arith.constant 0 : index
    %10 = vector.load %arg4[%c0_6, %c0_7] : memref<512x128xbf16, #tpu.memory_space<vmem>>, vector<512x128xbf16>
    %cst_8 = arith.constant dense<0.000000e+00> : vector<2x128xf32>
    %11 = tpu.matmul %9, %10, %cst_8 {dimension_numbers = #tpu.dot_dimension_numbers<[1], [0], [0], [1], [0, 0, 1, 1], [], []>} : vector<2x512xbf16>, vector<512x128xbf16>, vector<2x128xf32> -> vector<2x128xf32>
    %c0_9 = arith.constant 0 : index
    %c0_10 = arith.constant 0 : index
    %12 = vector.load %arg5[%c0_9, %c0_10] : memref<1x128xf32, #tpu.memory_space<vmem>>, vector<1x128xf32>
    %13 = vector.broadcast %12 : vector<1x128xf32> to vector<2x128xf32>
    %14 = arith.addf %11, %13 : vector<2x128xf32>
    %cst_11 = arith.constant 0.000000e+00 : f32
    %15 = vector.broadcast %cst_11 : f32 to vector<2x128xf32>
    %16 = arith.maximumf %14, %15 : vector<2x128xf32>
    %17 = arith.truncf %16 : vector<2x128xf32> to vector<2x128xbf16>
    %c0_12 = arith.constant 0 : index
    %c0_13 = arith.constant 0 : index
    %18 = vector.load %arg6[%c0_12, %c0_13] : memref<128x32xbf16, #tpu.memory_space<vmem>>, vector<128x32xbf16>
    %cst_14 = arith.constant dense<0.000000e+00> : vector<2x32xf32>
    %19 = tpu.matmul %17, %18, %cst_14 {dimension_numbers = #tpu.dot_dimension_numbers<[1], [0], [0], [1], [0, 0, 1, 1], [], []>} : vector<2x128xbf16>, vector<128x32xbf16>, vector<2x32xf32> -> vector<2x32xf32>
    %c0_15 = arith.constant 0 : index
    %c1024 = arith.constant 1024 : index
    %20 = vector.load %arg1[%c0_15, %c1024] : memref<2x1027xf32, #tpu.memory_space<vmem>>, vector<2x3xf32>
    %21 = arith.truncf %20 : vector<2x3xf32> to vector<2x3xbf16>
    %c0_16 = arith.constant 0 : index
    %c0_17 = arith.constant 0 : index
    %22 = vector.load %arg7[%c0_16, %c0_17] : memref<3x32xbf16, #tpu.memory_space<vmem>>, vector<3x32xbf16>
    %cst_18 = arith.constant dense<0.000000e+00> : vector<2x32xf32>
    %23 = tpu.matmul %21, %22, %cst_18 {dimension_numbers = #tpu.dot_dimension_numbers<[1], [0], [0], [1], [0, 0, 1, 1], [], []>} : vector<2x3xbf16>, vector<3x32xbf16>, vector<2x32xf32> -> vector<2x32xf32>
    %24 = arith.addf %19, %23 : vector<2x32xf32>
    %c0_19 = arith.constant 0 : index
    %c0_20 = arith.constant 0 : index
    %25 = vector.load %arg8[%c0_19, %c0_20] : memref<1x32xf32, #tpu.memory_space<vmem>>, vector<1x32xf32>
    %26 = vector.broadcast %25 : vector<1x32xf32> to vector<2x32xf32>
    %27 = arith.addf %24, %26 : vector<2x32xf32>
    %cst_21 = arith.constant 0.000000e+00 : f32
    %28 = vector.broadcast %cst_21 : f32 to vector<2x32xf32>
    %29 = arith.maximumf %27, %28 : vector<2x32xf32>
    %30 = arith.truncf %29 : vector<2x32xf32> to vector<2x32xbf16>
    %c0_22 = arith.constant 0 : index
    %c0_23 = arith.constant 0 : index
    %31 = vector.load %arg9[%c0_22, %c0_23] : memref<32x32xbf16, #tpu.memory_space<vmem>>, vector<32x32xbf16>
    %cst_24 = arith.constant dense<0.000000e+00> : vector<2x32xf32>
    %32 = tpu.matmul %30, %31, %cst_24 {dimension_numbers = #tpu.dot_dimension_numbers<[1], [0], [0], [1], [0, 0, 1, 1], [], []>} : vector<2x32xbf16>, vector<32x32xbf16>, vector<2x32xf32> -> vector<2x32xf32>
    %c0_25 = arith.constant 0 : index
    %c0_26 = arith.constant 0 : index
    %33 = vector.load %arg10[%c0_25, %c0_26] : memref<1x32xf32, #tpu.memory_space<vmem>>, vector<1x32xf32>
    %34 = vector.broadcast %33 : vector<1x32xf32> to vector<2x32xf32>
    %35 = arith.addf %32, %34 : vector<2x32xf32>
    %cst_27 = arith.constant 0.000000e+00 : f32
    %36 = vector.broadcast %cst_27 : f32 to vector<2x32xf32>
    %37 = arith.maximumf %35, %36 : vector<2x32xf32>
    %38 = arith.truncf %37 : vector<2x32xf32> to vector<2x32xbf16>
    %c0_28 = arith.constant 0 : index
    %c0_29 = arith.constant 0 : index
    %39 = vector.load %arg11[%c0_28, %c0_29] : memref<128x32xbf16, #tpu.memory_space<vmem>>, vector<128x32xbf16>
    %cst_30 = arith.constant dense<0.000000e+00> : vector<2x32xf32>
    %40 = tpu.matmul %17, %39, %cst_30 {dimension_numbers = #tpu.dot_dimension_numbers<[1], [0], [0], [1], [0, 0, 1, 1], [], []>} : vector<2x128xbf16>, vector<128x32xbf16>, vector<2x32xf32> -> vector<2x32xf32>
    %c0_31 = arith.constant 0 : index
    %c0_32 = arith.constant 0 : index
    %41 = vector.load %arg12[%c0_31, %c0_32] : memref<1x32xf32, #tpu.memory_space<vmem>>, vector<1x32xf32>
    %42 = vector.broadcast %41 : vector<1x32xf32> to vector<2x32xf32>
    %43 = arith.addf %40, %42 : vector<2x32xf32>
    %cst_33 = arith.constant 0.000000e+00 : f32
    %44 = vector.broadcast %cst_33 : f32 to vector<2x32xf32>
    %45 = arith.maximumf %43, %44 : vector<2x32xf32>
    %46 = arith.truncf %45 : vector<2x32xf32> to vector<2x32xbf16>
    %c0_34 = arith.constant 0 : index
    %c0_35 = arith.constant 0 : index
    %47 = vector.load %arg13[%c0_34, %c0_35] : memref<32x1xbf16, #tpu.memory_space<vmem>>, vector<32x1xbf16>
    %cst_36 = arith.constant dense<0.000000e+00> : vector<2x1xf32>
    %48 = tpu.matmul %46, %47, %cst_36 {dimension_numbers = #tpu.dot_dimension_numbers<[1], [0], [0], [1], [0, 0, 1, 1], [], []>} : vector<2x32xbf16>, vector<32x1xbf16>, vector<2x1xf32> -> vector<2x1xf32>
    %c0_37 = arith.constant 0 : index
    %c0_38 = arith.constant 0 : index
    %49 = vector.load %arg14[%c0_37, %c0_38] : memref<1x1xf32, #tpu.memory_space<vmem>>, vector<1x1xf32>
    %50 = vector.broadcast %49 : vector<1x1xf32> to vector<2x1xf32>
    %51 = arith.addf %48, %50 : vector<2x1xf32>
    %cst_39 = arith.constant 0.000000e+00 : f32
    %52 = vector.broadcast %cst_39 : f32 to vector<2x1xf32>
    %53 = arith.subf %52, %51 : vector<2x1xf32>
    %54 = math.exp %53 : vector<2x1xf32>
    %cst_40 = arith.constant 1.000000e+00 : f32
    %55 = vector.broadcast %cst_40 : f32 to vector<2x1xf32>
    %56 = arith.addf %55, %54 : vector<2x1xf32>
    %57 = tpu.reciprocal %56 {approx = true} : vector<2x1xf32> -> vector<2x1xf32>
    %c0_41 = arith.constant 0 : index
    %c0_42 = arith.constant 0 : index
    %58 = vector.load %arg15[%c0_41, %c0_42] : memref<32x12xbf16, #tpu.memory_space<vmem>>, vector<32x12xbf16>
    %cst_43 = arith.constant dense<0.000000e+00> : vector<2x12xf32>
    %59 = tpu.matmul %38, %58, %cst_43 {dimension_numbers = #tpu.dot_dimension_numbers<[1], [0], [0], [1], [0, 0, 1, 1], [], []>} : vector<2x32xbf16>, vector<32x12xbf16>, vector<2x12xf32> -> vector<2x12xf32>
    %c0_44 = arith.constant 0 : index
    %c0_45 = arith.constant 0 : index
    %60 = vector.load %arg16[%c0_44, %c0_45] : memref<1x12xf32, #tpu.memory_space<vmem>>, vector<1x12xf32>
    %61 = vector.broadcast %60 : vector<1x12xf32> to vector<2x12xf32>
    %62 = arith.addf %59, %61 : vector<2x12xf32>
    %63 = tpu.iota {dimensions = array<i32: 1>} : vector<2x12xi32>
    %cst_46 = arith.constant -2.000000e+01 : f32
    %cst_47 = arith.constant 2.000000e+00 : f32
    %64 = vector.broadcast %cst_46 : f32 to vector<2x12xf32>
    %65 = arith.maximumf %64, %62 : vector<2x12xf32>
    %66 = vector.broadcast %cst_47 : f32 to vector<2x12xf32>
    %67 = arith.minimumf %66, %65 : vector<2x12xf32>
    %68 = math.exp %67 : vector<2x12xf32>
    %c6_i32 = arith.constant 6 : i32
    %69 = vector.broadcast %c6_i32 : i32 to vector<2x12xi32>
    %70 = arith.cmpi slt, %63, %69 : vector<2x12xi32>
    %71 = arith.select %70, %62, %68 : vector<2x12xi1>, vector<2x12xf32>
    %c0_48 = arith.constant 0 : index
    %c0_49 = arith.constant 0 : index
    %72 = vector.load %arg17[%c0_48, %c0_49] : memref<2x13xf32, #tpu.memory_space<vmem>>, vector<2x12xf32>
    tpu.vector_store %arg17[%c0_48, %c0_49], %71 {strides = array<i32>} : memref<2x13xf32, #tpu.memory_space<vmem>>, vector<2x12xf32>,
    %c0_50 = arith.constant 0 : index
    %c12 = arith.constant 12 : index
    %73 = vector.load %arg17[%c0_50, %c12] : memref<2x13xf32, #tpu.memory_space<vmem>>, vector<2x1xf32>
    tpu.vector_store %arg17[%c0_50, %c12], %57 {strides = array<i32>} : memref<2x13xf32, #tpu.memory_space<vmem>>, vector<2x1xf32>,
    return
  }
  func.func @transform_0(%arg0: i32) -> (i32, i32) {
    %c0_i32 = arith.constant 0 : i32
    %c0_i32_0 = arith.constant 0 : i32
    return %arg0, %c0_i32 : i32, i32
  }
  func.func @transform_1(%arg0: i32) -> (i32, i32) {
    %c0_i32 = arith.constant 0 : i32
    %c0_i32_0 = arith.constant 0 : i32
    %c0_i32_1 = arith.constant 0 : i32
    return %c0_i32, %c0_i32_0 : i32, i32
  }
  func.func @transform_2(%arg0: i32) -> (i32, i32) {
    %c0_i32 = arith.constant 0 : i32
    %c0_i32_0 = arith.constant 0 : i32
    %c0_i32_1 = arith.constant 0 : i32
    return %c0_i32, %c0_i32_0 : i32, i32
  }
  func.func @transform_3(%arg0: i32) -> (i32, i32) {
    %c0_i32 = arith.constant 0 : i32
    %c0_i32_0 = arith.constant 0 : i32
    %c0_i32_1 = arith.constant 0 : i32
    return %c0_i32, %c0_i32_0 : i32, i32
  }
  func.func @transform_4(%arg0: i32) -> (i32, i32) {
    %c0_i32 = arith.constant 0 : i32
    %c0_i32_0 = arith.constant 0 : i32
    %c0_i32_1 = arith.constant 0 : i32
    return %c0_i32, %c0_i32_0 : i32, i32
  }
  func.func @transform_5(%arg0: i32) -> (i32, i32) {
    %c0_i32 = arith.constant 0 : i32
    %c0_i32_0 = arith.constant 0 : i32
    %c0_i32_1 = arith.constant 0 : i32
    return %c0_i32, %c0_i32_0 : i32, i32
  }
  func.func @transform_6(%arg0: i32) -> (i32, i32) {
    %c0_i32 = arith.constant 0 : i32
    %c0_i32_0 = arith.constant 0 : i32
    %c0_i32_1 = arith.constant 0 : i32
    return %c0_i32, %c0_i32_0 : i32, i32
  }
  func.func @transform_7(%arg0: i32) -> (i32, i32) {
    %c0_i32 = arith.constant 0 : i32
    %c0_i32_0 = arith.constant 0 : i32
    %c0_i32_1 = arith.constant 0 : i32
    return %c0_i32, %c0_i32_0 : i32, i32
  }
  func.func @transform_8(%arg0: i32) -> (i32, i32) {
    %c0_i32 = arith.constant 0 : i32
    %c0_i32_0 = arith.constant 0 : i32
    %c0_i32_1 = arith.constant 0 : i32
    return %c0_i32, %c0_i32_0 : i32, i32
  }
  func.func @transform_9(%arg0: i32) -> (i32, i32) {
    %c0_i32 = arith.constant 0 : i32
    %c0_i32_0 = arith.constant 0 : i32
    %c0_i32_1 = arith.constant 0 : i32
    return %c0_i32, %c0_i32_0 : i32, i32
  }
  func.func @transform_10(%arg0: i32) -> (i32, i32) {
    %c0_i32 = arith.constant 0 : i32
    %c0_i32_0 = arith.constant 0 : i32
    %c0_i32_1 = arith.constant 0 : i32
    return %c0_i32, %c0_i32_0 : i32, i32
  }
  func.func @transform_11(%arg0: i32) -> (i32, i32) {
    %c0_i32 = arith.constant 0 : i32
    %c0_i32_0 = arith.constant 0 : i32
    %c0_i32_1 = arith.constant 0 : i32
    return %c0_i32, %c0_i32_0 : i32, i32
  }
  func.func @transform_12(%arg0: i32) -> (i32, i32) {
    %c0_i32 = arith.constant 0 : i32
    %c0_i32_0 = arith.constant 0 : i32
    %c0_i32_1 = arith.constant 0 : i32
    return %c0_i32, %c0_i32_0 : i32, i32
  }
  func.func @transform_13(%arg0: i32) -> (i32, i32) {
    %c0_i32 = arith.constant 0 : i32
    %c0_i32_0 = arith.constant 0 : i32
    %c0_i32_1 = arith.constant 0 : i32
    return %c0_i32, %c0_i32_0 : i32, i32
  }
  func.func @transform_14(%arg0: i32) -> (i32, i32) {
    %c0_i32 = arith.constant 0 : i32
    %c0_i32_0 = arith.constant 0 : i32
    %c0_i32_1 = arith.constant 0 : i32
    return %c0_i32, %c0_i32_0 : i32, i32
  }
  func.func @transform_15(%arg0: i32) -> (i32, i32) {
    %c0_i32 = arith.constant 0 : i32
    %c0_i32_0 = arith.constant 0 : i32
    %c0_i32_1 = arith.constant 0 : i32
    return %c0_i32, %c0_i32_0 : i32, i32
  }
  func.func @transform_16(%arg0: i32) -> (i32, i32) {
    %c0_i32 = arith.constant 0 : i32
    %c0_i32_0 = arith.constant 0 : i32
    return %arg0, %c0_i32 : i32, i32
  }
}

</mosaic_0001>

<bundles_post_ra>
// kernel: forward.1
= control target key start
LH: loop header
LB: loop body
LE: loop exit
PB: predicated region body
PF: predicated region fallthrough
CT: control target
= control target key end

     0   :  { %s4183_s0 = inlined_call_operand.vmem [shape: f32[2,1027], index: 0, kind: input, shape index: {}]   ;;  %s4184_s1 = inlined_call_operand.hbm [shape: bf16[1024,512], index: 1, kind: input, shape index: {}]   ;;  %s4185_s2 = inlined_call_operand.vmem [shape: f32[1,512], index: 2, kind: input, shape index: {}]   ;;  %s4186_s3 = inlined_call_operand.hbm [shape: bf16[512,128], index: 3, kind: input, shape index: {}]   ;;  %s4187_s4 = inlined_call_operand.vmem [shape: f32[1,128], index: 4, kind: input, shape index: {}]   ;;  %s4188_s5 = inlined_call_operand.vmem [shape: bf16[128,32], index: 5, kind: input, shape index: {}]   ;;  %s4189_s6 = inlined_call_operand.vmem [shape: bf16[3,32], index: 6, kind: input, shape index: {}]   ;;  %s4190_s7 = inlined_call_operand.vmem [shape: f32[1,32], index: 7, kind: input, shape index: {}]   ;;  %s4191_s8 = inlined_call_operand.vmem [shape: bf16[32,32], index: 8, kind: input, shape index: {}]   ;;  %s4192_s9 = inlined_call_operand.vmem [shape: f32[1,32], index: 9, kind: input, shape index: {}]   ;;  %s4193_s10 = inlined_call_operand.vmem [shape: bf16[128,32], index: 10, kind: input, shape index: {}]   ;;  %s4194_s11 = inlined_call_operand.vmem [shape: f32[1,32], index: 11, kind: input, shape index: {}]   ;;  %s4195_s12 = inlined_call_operand.vmem [shape: bf16[32,1], index: 12, kind: input, shape index: {}]   ;;  %s4196_s13 = inlined_call_operand.<no memory space> [shape: f32[1,1], index: 13, kind: input, shape index: {}]   ;;  %s4197_s14 = inlined_call_operand.vmem [shape: bf16[32,12], index: 14, kind: input, shape index: {}]   ;;  %s4198_s15 = inlined_call_operand.vmem [shape: f32[1,12], index: 15, kind: input, shape index: {}]   ;;  %s4199_s16 = inlined_call_operand.vmem [shape: f32[2,13], index: 16, kind: output, shape index: {}]  }
   0x1   :  { %4201 = sst [smem:[#allocation9_spill]] %s4183_s0  ;;  %v21_v0 = vstv %s4196_s13 }
   0x2   :  { %22 = vst [vmem:[#allocation2] sm:$0x1] %v21_v0 }
   0x3   :  { %23 = vsyncpa [#allocation4], 0 }
   0x4   :  { %24 = vsyncpa [#allocation6], 0  ;;  %s3882_s23 = smov [#allocation3]   ;;  %s3834_s27 = scalar_lea.hbm %s4184_s1, 32768 }
   0x5   :  { %s32_s24 = sshll.u32 %s3882_s23, 4  ;;  %p3835_p0 = scmp.ne.s32.totalorder %s4184_s1, %s3834_s27  ;;  %s33_s24 = int_to_ptr.vmem [resolvable:$true] %s32_s24 }
   0x6   :  { %p3838_p1 = scmp.lt.u32.totalorder %s3834_s27, %s4184_s1 }
   0x8   :  { %p3840_p2 = pnand %p3838_p1, %p3835_p0 }
   0xa   :  { %3843 = shalt.err (!%p3840_p2)
}
   0xb   :  { %s3844_s13 = scalar_lea.vmem %s33_s24, 32768  ;;  %p3849_p4 = scmp.lt.s32.totalorder %s33_s24, %s33_s24 }
   0xc   :  { %p3845_p3 = scmp.ne.s32.totalorder %s33_s24, %s3844_s13  ;;  %p3850_p5 = scmp.lt.s32.totalorder %s3844_s13, %s3844_s13 }
   0xe   :  { %p3851_p6 = por %p3850_p5, %p3849_p4 }
  0x10   :  { %p3852_p7 = pnand %p3851_p6, %p3845_p3 }
  0x12   :  { %3855 = shalt.err (!%p3852_p7)
}
  0x13   :  { %s3883_s17 = smov 256   ;;  %s3884_s18 = smov 16  }
  0x14   :  { %38 = dma.hbm_to_vmem [thread:$0]  %s4184_s1, 32768, %s33_s24, [#allocation4], %s3883_s17, %s3883_s17, %s3884_s18  }
  0x15   :  { %s3885_s21 = smov [#allocation5]   ;;  %s3856_s26 = scalar_lea.hbm %s4186_s3, 4096 }
  0x16   :  { %s46_s22 = sshll.u32 %s3885_s21, 4  ;;  %p3857_p8 = scmp.ne.s32.totalorder %s4186_s3, %s3856_s26  ;;  %s47_s22 = int_to_ptr.vmem [resolvable:$true] %s46_s22 }
  0x17   :  { %p3860_p9 = scmp.lt.u32.totalorder %s3856_s26, %s4186_s3 }
  0x19   :  { %p3862_p10 = pnand %p3860_p9, %p3857_p8 }
  0x1b   :  { %3865 = shalt.err (!%p3862_p10)
}
  0x1c   :  { %s3866_s0 = scalar_lea.vmem %s47_s22, 4096  ;;  %p3871_p12 = scmp.lt.s32.totalorder %s47_s22, %s47_s22 }
  0x1d   :  { %p3867_p11 = scmp.ne.s32.totalorder %s47_s22, %s3866_s0  ;;  %p3872_p13 = scmp.lt.s32.totalorder %s3866_s0, %s3866_s0 }
  0x1f   :  { %p3873_p0 = por %p3872_p13, %p3871_p12 }
  0x21   :  { %p3874_p1 = pnand %p3873_p0, %p3867_p11 }
  0x23   :  { %3877 = shalt.err (!%p3874_p1)
}
  0x24   :  { %s3886_s1 = smov 64   ;;  %s3887_s24 = smov 4  }
  0x25   :  { %52 = dma.hbm_to_vmem [thread:$0]  %s4186_s3, 4096, %s47_s22, [#allocation6], %s3886_s1, %s3886_s1, %s3887_s24  }
  0x26   :  { %3878 = dma.done.wait [#allocation4], 32768  }
  0x27   :  { %3879 = vsyncadd [#allocation4], 4294934528 }
  0x28   :  { %3880 = dma.done.wait [#allocation6], 4096  }
  0x29   :  { %3881 = vsyncadd [#allocation6], 4294963200  ;;  %v3388_v1 = vld [vmem:[#allocation3 + $0x4] ss:$16 sps:$4 sm:$0xff]   ;;  %v3390_v2 = vld [vmem:[#allocation3 + $0xc] ss:$16 sps:$4 sm:$0xff]   ;;  %v92_v39 = vlaneseq }
  0x2a   :  { %1696 = vmatprep.subr.bf16.mxu0 %v3388_v1  ;;  %v3392_v3 = vld [vmem:[#allocation3] ss:$16 sps:$4 sm:$0xff]   ;;  %v3393_v4 = vld [vmem:[#allocation3 + $0x8] ss:$16 sps:$4 sm:$0xff]   ;;  %1860 = vmatprep.subr.bf16.mxu1 %v3390_v2  ;;  %v3394_v5 = vld [vmem:[#allocation3 + $0x24] ss:$16 sps:$4 sm:$0xff]  }
  0x2b   :  { %1697 = vmatpush1.bf16.msra.mxu0 %v3392_v3  ;;  %1861 = vmatpush1.bf16.msra.mxu1 %v3393_v4  ;;  %v3396_v6 = vld [vmem:[#allocation3 + $0x2c] ss:$16 sps:$4 sm:$0xff]   ;;  %v3398_v7 = vld [vmem:[#allocation3 + $0x20] ss:$16 sps:$4 sm:$0xff]   ;;  %v3399_v8 = vld [vmem:[#allocation3 + $0x28] ss:$16 sps:$4 sm:$0xff]  }
  0x2c   :  { %1698 = vmatprep.subr.bf16.mxu0 %v3394_v5  ;;  %1862 = vmatprep.subr.bf16.mxu1 %v3396_v6  ;;  %v3400_v9 = vld [vmem:[#allocation3 + $0x44] ss:$16 sps:$4 sm:$0xff]   ;;  %v3402_v10 = vld [vmem:[#allocation3 + $0x4c] ss:$16 sps:$4 sm:$0xff]   ;;  %v3404_v11 = vld [vmem:[#allocation3 + $0x40] ss:$16 sps:$4 sm:$0xff]  }
  0x2d   :  { %v3405_v12 = vld [vmem:[#allocation3 + $0x48] ss:$16 sps:$4 sm:$0xff]   ;;  %v3406_v13 = vld [vmem:[#allocation3 + $0x64] ss:$16 sps:$4 sm:$0xff]   ;;  %v3408_v14 = vld [vmem:[#allocation3 + $0x6c] ss:$16 sps:$4 sm:$0xff]  }
  0x2e   :  { %v3410_v15 = vld [vmem:[#allocation3 + $0x60] ss:$16 sps:$4 sm:$0xff]   ;;  %v3411_v16 = vld [vmem:[#allocation3 + $0x68] ss:$16 sps:$4 sm:$0xff]   ;;  %v3412_v17 = vld [vmem:[#allocation3 + $0x84] ss:$16 sps:$4 sm:$0xff]  }
  0x2f   :  { %1699 = vmatpush1.bf16.msra.mxu0 %v3398_v7  ;;  %1863 = vmatpush1.bf16.msra.mxu1 %v3399_v8  ;;  %v3414_v18 = vld [vmem:[#allocation3 + $0x8c] ss:$16 sps:$4 sm:$0xff]   ;;  %v3416_v19 = vld [vmem:[#allocation3 + $0x80] ss:$16 sps:$4 sm:$0xff]   ;;  %v3417_v20 = vld [vmem:[#allocation3 + $0x88] ss:$16 sps:$4 sm:$0xff]  }
  0x30   :  { %1700 = vmatprep.subr.bf16.mxu0 %v3400_v9  ;;  %1864 = vmatprep.subr.bf16.mxu1 %v3402_v10  ;;  %v3418_v21 = vld [vmem:[#allocation3 + $0xa4] ss:$16 sps:$4 sm:$0xff]   ;;  %v3420_v22 = vld [vmem:[#allocation3 + $0xac] ss:$16 sps:$4 sm:$0xff]   ;;  %v3422_v23 = vld [vmem:[#allocation3 + $0xa0] ss:$16 sps:$4 sm:$0xff]  }
  0x31   :  { %v3423_v24 = vld [vmem:[#allocation3 + $0xa8] ss:$16 sps:$4 sm:$0xff]   ;;  %v3424_v25 = vld [vmem:[#allocation3 + $0xc4] ss:$16 sps:$4 sm:$0xff]   ;;  %v3426_v26 = vld [vmem:[#allocation3 + $0xcc] ss:$16 sps:$4 sm:$0xff]  }
  0x32   :  { %v3428_v27 = vld [vmem:[#allocation3 + $0xc0] ss:$16 sps:$4 sm:$0xff]   ;;  %v3429_v28 = vld [vmem:[#allocation3 + $0xc8] ss:$16 sps:$4 sm:$0xff]   ;;  %v3430_v29 = vld [vmem:[#allocation3 + $0xe4] ss:$16 sps:$4 sm:$0xff]  }
  0x33   :  { %1701 = vmatpush1.bf16.msra.mxu0 %v3404_v11  ;;  %1865 = vmatpush1.bf16.msra.mxu1 %v3405_v12  ;;  %v3432_v30 = vld [vmem:[#allocation3 + $0xec] ss:$16 sps:$4 sm:$0xff]   ;;  %v3434_v31 = vld [vmem:[#allocation3 + $0xe0] ss:$16 sps:$4 sm:$0xff]   ;;  %v3435_v32 = vld [vmem:[#allocation3 + $0xe8] ss:$16 sps:$4 sm:$0xff]  }
  0x34   :  { %1702 = vmatprep.subr.bf16.mxu0 %v3406_v13  ;;  %1866 = vmatprep.subr.bf16.mxu1 %v3408_v14  ;;  %v3436_v33 = vld [vmem:[#allocation3 + $0x104] ss:$16 sps:$4 sm:$0xff]   ;;  %v3438_v34 = vld [vmem:[#allocation3 + $0x10c] ss:$16 sps:$4 sm:$0xff]   ;;  %v3440_v35 = vld [vmem:[#allocation3 + $0x100] ss:$16 sps:$4 sm:$0xff]  }
  0x35   :  { %v3441_v36 = vld [vmem:[#allocation3 + $0x108] ss:$16 sps:$4 sm:$0xff]   ;;  %v3888_v37 = vmov 1983009808   ;;  %v3442_v40 = vld [vmem:[#allocation3 + $0x124] ss:$16 sps:$4 sm:$0xff]  }
  0x36   :  { %v90_v38 = vunpack.c.l.s4 %v3888_v37  ;;  %v3444_v41 = vld [vmem:[#allocation3 + $0x12c] ss:$16 sps:$4 sm:$0xff]   ;;  %v3446_v42 = vld [vmem:[#allocation3 + $0x120] ss:$16 sps:$4 sm:$0xff]   ;;  %v4006_v44 = vshrl.u32 %v92_v39, 7  ;;  %s4202_s19 = sld [smem:[#allocation9_spill]] }
  0x37   :  { %1703 = vmatpush1.bf16.msra.mxu0 %v3410_v15  ;;  %1867 = vmatpush1.bf16.msra.mxu1 %v3411_v16  ;;  %v3447_v45 = vld [vmem:[#allocation3 + $0x128] ss:$16 sps:$4 sm:$0xff]   ;;  %v3448_v46 = vld [vmem:[#allocation3 + $0x144] ss:$16 sps:$4 sm:$0xff]   ;;  %v3450_v47 = vld [vmem:[#allocation3 + $0x14c] ss:$16 sps:$4 sm:$0xff]  }
  0x38   :  { %1704 = vmatprep.subr.bf16.mxu0 %v3412_v17  ;;  %1868 = vmatprep.subr.bf16.mxu1 %v3414_v18  ;;  %v91_v43 = vunpack.c.0.s8 %v90_v38  ;;  %v3452_v48 = vld [vmem:[#allocation3 + $0x140] ss:$16 sps:$4 sm:$0xff]   ;;  %v3453_v49 = vld [vmem:[#allocation3 + $0x148] ss:$16 sps:$4 sm:$0xff]   ;;  %v3454_v51 = vld [vmem:[#allocation3 + $0x164] ss:$16 sps:$4 sm:$0xff]  }
  0x39   :  { %v3456_v52 = vld [vmem:[#allocation3 + $0x16c] ss:$16 sps:$4 sm:$0xff]   ;;  %v3458_v54 = vld [vmem:[#allocation3 + $0x160] ss:$16 sps:$4 sm:$0xff]   ;;  %v3459_v56 = vld [vmem:[#allocation3 + $0x168] ss:$16 sps:$4 sm:$0xff]  }
  0x3a   :  { %v4009_v50 = vsub.s32 %v91_v43, %v4006_v44  ;;  %v3460_v57 = vld [vmem:[#allocation3 + $0x184] ss:$16 sps:$4 sm:$0xff]   ;;  %v3462_v58 = vld [vmem:[#allocation3 + $0x18c] ss:$16 sps:$4 sm:$0xff]   ;;  %v3464_v60 = vld [vmem:[#allocation3 + $0x180] ss:$16 sps:$4 sm:$0xff]  }
  0x3b   :  { %1705 = vmatpush1.bf16.msra.mxu0 %v3416_v19  ;;  %1869 = vmatpush1.bf16.msra.mxu1 %v3417_v20  ;;  %v3465_v62 = vld [vmem:[#allocation3 + $0x188] ss:$16 sps:$4 sm:$0xff]   ;;  %v3466_v63 = vld [vmem:[#allocation3 + $0x1a4] ss:$16 sps:$4 sm:$0xff]   ;;  %v3468_v0 = vld [vmem:[#allocation3 + $0x1ac] ss:$16 sps:$4 sm:$0xff]  }
  0x3c   :  { %1706 = vmatprep.subr.bf16.mxu0 %v3418_v21  ;;  %1870 = vmatprep.subr.bf16.mxu1 %v3420_v22  ;;  %v84_v53 = vld [vmem:[%s4202_s19] sm:$0xff]  ;;  %v3471_v2 = vld [vmem:[#allocation3 + $0x1a8] ss:$16 sps:$4 sm:$0xff]   ;;  %vm2400_vm0 = vcmask 1040384   ;;  %vm2401_vm1 = vcmask 1041408   ;;  %vm3891_vm2 = vmmov 0  }
  0x3d   :  { %v95_v55 = vrot.slane %v84_v53, %v4009_v50  ;;  %v3470_v1 = vld [vmem:[#allocation3 + $0x1a0] ss:$16 sps:$4 sm:$0xff]   ;;  %v3472_v3 = vld [vmem:[#allocation3 + $0x1c4] ss:$16 sps:$4 sm:$0xff]   ;;  %v3474_v4 = vld [vmem:[#allocation3 + $0x1cc] ss:$16 sps:$4 sm:$0xff]   ;;  %v88_v5 = vcombine.high %v84_v53, %v84_v53 }
  0x3e   :  { %v3476_v6 = vld [vmem:[#allocation3 + $0x1c0] ss:$16 sps:$4 sm:$0xff]   ;;  %v3477_v7 = vld [vmem:[#allocation3 + $0x1c8] ss:$16 sps:$4 sm:$0xff]   ;;  %v3478_v8 = vld [vmem:[#allocation3 + $0x1e4] ss:$16 sps:$4 sm:$0xff]  }
  0x3f   :  { %1707 = vmatpush1.bf16.msra.mxu0 %v3422_v23  ;;  %1871 = vmatpush1.bf16.msra.mxu1 %v3423_v24  ;;  %v103_v59 = vcombine.high %v95_v55, %v95_v55  ;;  %v3480_v9 = vld [vmem:[#allocation3 + $0x1ec] ss:$16 sps:$4 sm:$0xff]   ;;  %v4016_v10 = vrot.slane %v88_v5, %v4009_v50  ;;  %v3482_v11 = vld [vmem:[#allocation3 + $0x1e0] ss:$16 sps:$4 sm:$0xff]   ;;  %v3483_v12 = vld [vmem:[#allocation3 + $0x1e8] ss:$16 sps:$4 sm:$0xff]   ;;  %v130_v17 = vpack.c.bf16 %v95_v55, %v95_v55 }
  0x40   :  { %1708 = vmatprep.subr.bf16.mxu0 %v3424_v25  ;;  %1872 = vmatprep.subr.bf16.mxu1 %v3426_v26  ;;  %v3487_v13 = vld [vmem:[#allocation3 + $0x204] ss:$16 sps:$4 sm:$0xff]   ;;  %v3490_v14 = vld [vmem:[#allocation3 + $0x20c] ss:$16 sps:$4 sm:$0xff]   ;;  %v3485_v16 = vld [vmem:[#allocation3 + $0x200] ss:$16 sps:$4 sm:$0xff]  }
  0x41   :  { %v131_v61 = vpack.c.bf16 %v103_v59, %v103_v59  ;;  %v104_v15 = vcombine.high %v4016_v10, %v4016_v10  ;;  %v3488_v18 = vld [vmem:[#allocation3 + $0x208] ss:$16 sps:$4 sm:$0xff]   ;;  %v3493_v19 = vld [vmem:[#allocation3 + $0x224] ss:$16 sps:$4 sm:$0xff]   ;;  %v3496_v20 = vld [vmem:[#allocation3 + $0x22c] ss:$16 sps:$4 sm:$0xff]  }
  0x42   :  { %v3491_v22 = vld [vmem:[#allocation3 + $0x220] ss:$16 sps:$4 sm:$0xff]   ;;  %v3494_v23 = vld [vmem:[#allocation3 + $0x228] ss:$16 sps:$4 sm:$0xff]   ;;  %v3499_v24 = vld [vmem:[#allocation3 + $0x244] ss:$16 sps:$4 sm:$0xff]  }
  0x43   :  { %1709 = vmatpush1.bf16.msra.mxu0 %v3428_v27  ;;  %1873 = vmatpush1.bf16.msra.mxu1 %v3429_v28  ;;  %v133_v21 = vpack.c.bf16 %v104_v15, %v104_v15  ;;  %v3502_v25 = vld [vmem:[#allocation3 + $0x24c] ss:$16 sps:$4 sm:$0xff]   ;;  %v3497_v26 = vld [vmem:[#allocation3 + $0x240] ss:$16 sps:$4 sm:$0xff]   ;;  %v3500_v27 = vld [vmem:[#allocation3 + $0x248] ss:$16 sps:$4 sm:$0xff]  }
  0x44   :  { %1710 = vmatprep.subr.bf16.mxu0 %v3430_v29  ;;  %1874 = vmatprep.subr.bf16.mxu1 %v3432_v30  ;;  %v3505_v28 = vld [vmem:[#allocation3 + $0x264] ss:$16 sps:$4 sm:$0xff]   ;;  %v3508_v29 = vld [vmem:[#allocation3 + $0x26c] ss:$16 sps:$4 sm:$0xff]   ;;  %v3503_v30 = vld [vmem:[#allocation3 + $0x260] ss:$16 sps:$4 sm:$0xff]  }
  0x45   :  { %1728 = vmatprep.mubr.bf16.mxu0 %v131_v61  ;;  %1892 = vmatprep.mubr.bf16.mxu1 %v131_v61  ;;  %v3520_v37 = vld [vmem:[#allocation3 + $0x2ac] ss:$16 sps:$4 sm:$0xff]   ;;  %v3515_v38 = vld [vmem:[#allocation3 + $0x2a0] ss:$16 sps:$4 sm:$0xff]   ;;  %v3541_v55 = vld [vmem:[#allocation3 + $0x324] ss:$16 sps:$4 sm:$0xff]  }
  0x46   :  { %v3521_v43 = vld [vmem:[#allocation3 + $0x2c0] ss:$16 sps:$4 sm:$0xff]   ;;  %v3547_v59 = vld [vmem:[#allocation3 + $0x344] ss:$16 sps:$4 sm:$0xff]   ;;  %v3572_v15 = vld [vmem:[#allocation3 + $0x3c8] ss:$16 sps:$4 sm:$0xff]  }
  0x47   :  { %1711 = vmatpush1.bf16.msra.mxu0 %v3434_v31  ;;  %1875 = vmatpush1.bf16.msra.mxu1 %v3435_v32  ;;  %v3506_v31 = vld [vmem:[#allocation3 + $0x268] ss:$16 sps:$4 sm:$0xff]   ;;  %v3511_v32 = vld [vmem:[#allocation3 + $0x284] ss:$16 sps:$4 sm:$0xff]   ;;  %v3533_v53 = vld [vmem:[#allocation3 + $0x300] ss:$16 sps:$4 sm:$0xff]  }
  0x48   :  { %1712 = vmatprep.subr.bf16.mxu0 %v3436_v33  ;;  %1876 = vmatprep.subr.bf16.mxu1 %v3438_v34  ;;  %v3514_v33 = vld [vmem:[#allocation3 + $0x28c] ss:$16 sps:$4 sm:$0xff]   ;;  %v3509_v34 = vld [vmem:[#allocation3 + $0x280] ss:$16 sps:$4 sm:$0xff]   ;;  %vm2396_vm3 = vcmask 23552   ;;  %vm2568_vm4 = vcmask 261120  }
  0x49   :  { %v3545_v61 = vld [vmem:[#allocation3 + $0x340] ss:$16 sps:$4 sm:$0xff]   ;;  %vm2872_vm6 = vcmask 91136   ;;  %vm2878_vm7 = vcmask 99424  }
  0x4a   :  { %v3557_v5 = vld [vmem:[#allocation3 + $0x380] ss:$16 sps:$4 sm:$0xff]  }
  0x4b   :  { %1713 = vmatpush1.bf16.msra.mxu0 %v3440_v35  ;;  %1877 = vmatpush1.bf16.msra.mxu1 %v3441_v36  ;;  %v3512_v35 = vld [vmem:[#allocation3 + $0x288] ss:$16 sps:$4 sm:$0xff]   ;;  %v3517_v36 = vld [vmem:[#allocation3 + $0x2a4] ss:$16 sps:$4 sm:$0xff]  }
  0x4c   :  { %1714 = vmatprep.subr.bf16.mxu0 %v3442_v40  ;;  %1878 = vmatprep.subr.bf16.mxu1 %v3444_v41  ;;  %v3518_v40 = vld [vmem:[#allocation3 + $0x2a8] ss:$16 sps:$4 sm:$0xff]   ;;  %v3523_v41 = vld [vmem:[#allocation3 + $0x2c4] ss:$16 sps:$4 sm:$0xff]  }
  0x4f   :  { %1715 = vmatpush1.bf16.msra.mxu0 %v3446_v42  ;;  %1879 = vmatpush1.bf16.msra.mxu1 %v3447_v45  ;;  %v3526_v42 = vld [vmem:[#allocation3 + $0x2cc] ss:$16 sps:$4 sm:$0xff]   ;;  %v3524_v45 = vld [vmem:[#allocation3 + $0x2c8] ss:$16 sps:$4 sm:$0xff]  }
  0x50   :  { %1716 = vmatprep.subr.bf16.mxu0 %v3448_v46  ;;  %1880 = vmatprep.subr.bf16.mxu1 %v3450_v47  ;;  %v3529_v46 = vld [vmem:[#allocation3 + $0x2e4] ss:$16 sps:$4 sm:$0xff]   ;;  %v3532_v47 = vld [vmem:[#allocation3 + $0x2ec] ss:$16 sps:$4 sm:$0xff]  }
  0x53   :  { %1717 = vmatpush1.bf16.msra.mxu0 %v3452_v48  ;;  %1881 = vmatpush1.bf16.msra.mxu1 %v3453_v49  ;;  %v3527_v48 = vld [vmem:[#allocation3 + $0x2e0] ss:$16 sps:$4 sm:$0xff]   ;;  %v3530_v49 = vld [vmem:[#allocation3 + $0x2e8] ss:$16 sps:$4 sm:$0xff]  }
  0x54   :  { %1718 = vmatprep.subr.bf16.mxu0 %v3454_v51  ;;  %1882 = vmatprep.subr.bf16.mxu1 %v3456_v52  ;;  %v3535_v51 = vld [vmem:[#allocation3 + $0x304] ss:$16 sps:$4 sm:$0xff]   ;;  %v3538_v52 = vld [vmem:[#allocation3 + $0x30c] ss:$16 sps:$4 sm:$0xff]  }
  0x57   :  { %1719 = vmatpush1.bf16.msra.mxu0 %v3458_v54  ;;  %1883 = vmatpush1.bf16.msra.mxu1 %v3459_v56  ;;  %v3536_v54 = vld [vmem:[#allocation3 + $0x308] ss:$16 sps:$4 sm:$0xff]   ;;  %v3544_v56 = vld [vmem:[#allocation3 + $0x32c] ss:$16 sps:$4 sm:$0xff]  }
  0x58   :  { %1720 = vmatprep.subr.bf16.mxu0 %v3460_v57  ;;  %1884 = vmatprep.subr.bf16.mxu1 %v3462_v58  ;;  %v3539_v57 = vld [vmem:[#allocation3 + $0x320] ss:$16 sps:$4 sm:$0xff]   ;;  %v3542_v58 = vld [vmem:[#allocation3 + $0x328] ss:$16 sps:$4 sm:$0xff]  }
  0x5b   :  { %1721 = vmatpush1.bf16.msra.mxu0 %v3464_v60  ;;  %1885 = vmatpush1.bf16.msra.mxu1 %v3465_v62  ;;  %v3550_v60 = vld [vmem:[#allocation3 + $0x34c] ss:$16 sps:$4 sm:$0xff]   ;;  %v3548_v62 = vld [vmem:[#allocation3 + $0x348] ss:$16 sps:$4 sm:$0xff]  }
  0x5c   :  { %1722 = vmatprep.subr.bf16.mxu0 %v3466_v63  ;;  %1886 = vmatprep.subr.bf16.mxu1 %v3468_v0  ;;  %v3553_v63 = vld [vmem:[#allocation3 + $0x364] ss:$16 sps:$4 sm:$0xff]   ;;  %v3556_v0 = vld [vmem:[#allocation3 + $0x36c] ss:$16 sps:$4 sm:$0xff]  }
  0x5f   :  { %1723 = vmatpush1.bf16.msra.mxu0 %v3470_v1  ;;  %1887 = vmatpush1.bf16.msra.mxu1 %v3471_v2  ;;  %v3551_v1 = vld [vmem:[#allocation3 + $0x360] ss:$16 sps:$4 sm:$0xff]   ;;  %v3554_v2 = vld [vmem:[#allocation3 + $0x368] ss:$16 sps:$4 sm:$0xff]  }
  0x60   :  { %1724 = vmatprep.subr.bf16.mxu0 %v3472_v3  ;;  %1888 = vmatprep.subr.bf16.mxu1 %v3474_v4  ;;  %v3559_v3 = vld [vmem:[#allocation3 + $0x384] ss:$16 sps:$4 sm:$0xff]   ;;  %v3562_v4 = vld [vmem:[#allocation3 + $0x38c] ss:$16 sps:$4 sm:$0xff]  }
  0x63   :  { %1725 = vmatpush1.bf16.msra.mxu0 %v3476_v6  ;;  %1889 = vmatpush1.bf16.msra.mxu1 %v3477_v7  ;;  %v3560_v6 = vld [vmem:[#allocation3 + $0x388] ss:$16 sps:$4 sm:$0xff]   ;;  %v3565_v7 = vld [vmem:[#allocation3 + $0x3a4] ss:$16 sps:$4 sm:$0xff]  }
  0x64   :  { %1726 = vmatprep.subr.bf16.mxu0 %v3478_v8  ;;  %1890 = vmatprep.subr.bf16.mxu1 %v3480_v9  ;;  %v3568_v8 = vld [vmem:[#allocation3 + $0x3ac] ss:$16 sps:$4 sm:$0xff]   ;;  %v3563_v9 = vld [vmem:[#allocation3 + $0x3a0] ss:$16 sps:$4 sm:$0xff]  }
  0x67   :  { %1727 = vmatpush1.bf16.msra.mxu0 %v3482_v11  ;;  %1891 = vmatpush1.bf16.msra.mxu1 %v3483_v12  ;;  %v3566_v11 = vld [vmem:[#allocation3 + $0x3a8] ss:$16 sps:$4 sm:$0xff]   ;;  %v3571_v12 = vld [vmem:[#allocation3 + $0x3c4] ss:$16 sps:$4 sm:$0xff]  }
  0x68   :  { %1737 = vmatprep.subr.bf16.mxu0 %v3487_v13  ;;  %1901 = vmatprep.subr.bf16.mxu1 %v3490_v14  ;;  %v3574_v13 = vld [vmem:[#allocation3 + $0x3cc] ss:$16 sps:$4 sm:$0xff]   ;;  %v3569_v14 = vld [vmem:[#allocation3 + $0x3c0] ss:$16 sps:$4 sm:$0xff]  }
  0x6a   :  { %1729 = vmatmul.mubr.bf16.vlgmr.msra.gmra.mrb[0].mxu0 %v130_v17  ;;  %1893 = vmatmul.mubr.bf16.vlgmr.msra.gmra.mrb[0].mxu1 %v130_v17  ;;  %v3580_v17 = vld [vmem:[#allocation3 + $0x3ec] ss:$16 sps:$4 sm:$0xff]  }
  0x6b   :  { %1738 = vmatpush1.bf16.msra.mxu0 %v3485_v16  ;;  %1902 = vmatpush1.bf16.msra.mxu1 %v3488_v18  ;;  %v3577_v16 = vld [vmem:[#allocation3 + $0x3e4] ss:$16 sps:$4 sm:$0xff]   ;;  %v3575_v18 = vld [vmem:[#allocation3 + $0x3e0] ss:$16 sps:$4 sm:$0xff]  }
  0x6c   :  { %1739 = vmatprep.subr.bf16.mxu0 %v3493_v19  ;;  %1903 = vmatprep.subr.bf16.mxu1 %v3496_v20  ;;  %v3578_v19 = vld [vmem:[#allocation3 + $0x3e8] ss:$16 sps:$4 sm:$0xff]   ;;  %v3583_v20 = vld [vmem:[#allocation3 + $0x404] ss:$16 sps:$4 sm:$0xff]  }
  0x6d   :  { %1769 = vmatprep.mubr.bf16.mxu0 %v133_v21  ;;  %1933 = vmatprep.mubr.bf16.mxu1 %v133_v21  ;;  %v3586_v21 = vld [vmem:[#allocation3 + $0x40c] ss:$16 sps:$4 sm:$0xff]  }
  0x6f   :  { %1740 = vmatpush1.bf16.msra.mxu0 %v3491_v22  ;;  %1904 = vmatpush1.bf16.msra.mxu1 %v3494_v23  ;;  %v3581_v22 = vld [vmem:[#allocation3 + $0x400] ss:$16 sps:$4 sm:$0xff]   ;;  %v132_v23 = vpack.c.bf16 %v4016_v10, %v4016_v10 }
  0x70   :  { %1741 = vmatprep.subr.bf16.mxu0 %v3499_v24  ;;  %1905 = vmatprep.subr.bf16.mxu1 %v3502_v25  ;;  %v3584_v24 = vld [vmem:[#allocation3 + $0x408] ss:$16 sps:$4 sm:$0xff]  }
  0x71   :  { %v4025_v25 = vld [vmem:[%s4202_s19 + $0x8] sm:$0xff] }
  0x73   :  { %1742 = vmatpush1.bf16.msra.mxu0 %v3497_v26  ;;  %1906 = vmatpush1.bf16.msra.mxu1 %v3500_v27  ;;  %v3589_v26 = vld [vmem:[#allocation3 + $0x424] ss:$16 sps:$4 sm:$0xff]   ;;  %v3592_v27 = vld [vmem:[#allocation3 + $0x42c] ss:$16 sps:$4 sm:$0xff]  }
  0x74   :  { %1743 = vmatprep.subr.bf16.mxu0 %v3505_v28  ;;  %1907 = vmatprep.subr.bf16.mxu1 %v3508_v29  ;;  %v4029_v28 = vrot.slane %v4025_v25, %v4009_v50  ;;  %v3587_v29 = vld [vmem:[#allocation3 + $0x420] ss:$16 sps:$4 sm:$0xff]  }
  0x76   :  { %v120_v10 = vcombine.high %v4029_v28, %v4029_v28 }
  0x77   :  { %1744 = vmatpush1.bf16.msra.mxu0 %v3503_v30  ;;  %1908 = vmatpush1.bf16.msra.mxu1 %v3506_v31  ;;  %v3590_v30 = vld [vmem:[#allocation3 + $0x428] ss:$16 sps:$4 sm:$0xff]   ;;  %v3595_v31 = vld [vmem:[#allocation3 + $0x444] ss:$16 sps:$4 sm:$0xff]  }
  0x78   :  { %1745 = vmatprep.subr.bf16.mxu0 %v3511_v32  ;;  %1909 = vmatprep.subr.bf16.mxu1 %v3514_v33  ;;  %v3598_v32 = vld [vmem:[#allocation3 + $0x44c] ss:$16 sps:$4 sm:$0xff]   ;;  %v135_v33 = vpack.c.bf16 %v120_v10, %v120_v10  ;;  %v3671_v10 = vld [vmem:[#allocation3 + $0x5e0] ss:$16 sps:$4 sm:$0xff]  }
  0x7b   :  { %1746 = vmatpush1.bf16.msra.mxu0 %v3509_v34  ;;  %1910 = vmatpush1.bf16.msra.mxu1 %v3512_v35  ;;  %v3593_v34 = vld [vmem:[#allocation3 + $0x440] ss:$16 sps:$4 sm:$0xff]   ;;  %v3596_v35 = vld [vmem:[#allocation3 + $0x448] ss:$16 sps:$4 sm:$0xff]  }
  0x7c   :  { %1747 = vmatprep.subr.bf16.mxu0 %v3517_v36  ;;  %1911 = vmatprep.subr.bf16.mxu1 %v3520_v37  ;;  %v3601_v36 = vld [vmem:[#allocation3 + $0x464] ss:$16 sps:$4 sm:$0xff]   ;;  %v3604_v37 = vld [vmem:[#allocation3 + $0x46c] ss:$16 sps:$4 sm:$0xff]  }
  0x7f   :  { %1748 = vmatpush1.bf16.msra.mxu0 %v3515_v38  ;;  %1912 = vmatpush1.bf16.msra.mxu1 %v3518_v40  ;;  %v3599_v38 = vld [vmem:[#allocation3 + $0x460] ss:$16 sps:$4 sm:$0xff]   ;;  %v3602_v40 = vld [vmem:[#allocation3 + $0x468] ss:$16 sps:$4 sm:$0xff]  }
  0x80   :  { %1749 = vmatprep.subr.bf16.mxu0 %v3523_v41  ;;  %1913 = vmatprep.subr.bf16.mxu1 %v3526_v42  ;;  %v3607_v41 = vld [vmem:[#allocation3 + $0x484] ss:$16 sps:$4 sm:$0xff]   ;;  %v3610_v42 = vld [vmem:[#allocation3 + $0x48c] ss:$16 sps:$4 sm:$0xff]  }
  0x83   :  { %1750 = vmatpush1.bf16.msra.mxu0 %v3521_v43  ;;  %1914 = vmatpush1.bf16.msra.mxu1 %v3524_v45  ;;  %v3605_v43 = vld [vmem:[#allocation3 + $0x480] ss:$16 sps:$4 sm:$0xff]   ;;  %v3608_v45 = vld [vmem:[#allocation3 + $0x488] ss:$16 sps:$4 sm:$0xff]  }
  0x84   :  { %1751 = vmatprep.subr.bf16.mxu0 %v3529_v46  ;;  %1915 = vmatprep.subr.bf16.mxu1 %v3532_v47  ;;  %v3613_v46 = vld [vmem:[#allocation3 + $0x4a4] ss:$16 sps:$4 sm:$0xff]   ;;  %v3616_v47 = vld [vmem:[#allocation3 + $0x4ac] ss:$16 sps:$4 sm:$0xff]  }
  0x87   :  { %1752 = vmatpush1.bf16.msra.mxu0 %v3527_v48  ;;  %1916 = vmatpush1.bf16.msra.mxu1 %v3530_v49  ;;  %v3611_v48 = vld [vmem:[#allocation3 + $0x4a0] ss:$16 sps:$4 sm:$0xff]   ;;  %v3614_v49 = vld [vmem:[#allocation3 + $0x4a8] ss:$16 sps:$4 sm:$0xff]  }
  0x88   :  { %1753 = vmatprep.subr.bf16.mxu0 %v3535_v51  ;;  %1917 = vmatprep.subr.bf16.mxu1 %v3538_v52  ;;  %v3619_v51 = vld [vmem:[#allocation3 + $0x4c4] ss:$16 sps:$4 sm:$0xff]   ;;  %v3622_v52 = vld [vmem:[#allocation3 + $0x4cc] ss:$16 sps:$4 sm:$0xff]  }
  0x8b   :  { %1754 = vmatpush1.bf16.msra.mxu0 %v3533_v53  ;;  %1918 = vmatpush1.bf16.msra.mxu1 %v3536_v54  ;;  %v3617_v53 = vld [vmem:[#allocation3 + $0x4c0] ss:$16 sps:$4 sm:$0xff]   ;;  %v3620_v54 = vld [vmem:[#allocation3 + $0x4c8] ss:$16 sps:$4 sm:$0xff]  }
  0x8c   :  { %1755 = vmatprep.subr.bf16.mxu0 %v3541_v55  ;;  %1919 = vmatprep.subr.bf16.mxu1 %v3544_v56  ;;  %v3625_v55 = vld [vmem:[#allocation3 + $0x4e4] ss:$16 sps:$4 sm:$0xff]   ;;  %v3628_v56 = vld [vmem:[#allocation3 + $0x4ec] ss:$16 sps:$4 sm:$0xff]  }
  0x8f   :  { %1756 = vmatpush1.bf16.msra.mxu0 %v3539_v57  ;;  %1920 = vmatpush1.bf16.msra.mxu1 %v3542_v58  ;;  %v3623_v57 = vld [vmem:[#allocation3 + $0x4e0] ss:$16 sps:$4 sm:$0xff]   ;;  %v3626_v58 = vld [vmem:[#allocation3 + $0x4e8] ss:$16 sps:$4 sm:$0xff]  }
  0x90   :  { %1757 = vmatprep.subr.bf16.mxu0 %v3547_v59  ;;  %1921 = vmatprep.subr.bf16.mxu1 %v3550_v60  ;;  %v3631_v59 = vld [vmem:[#allocation3 + $0x504] ss:$16 sps:$4 sm:$0xff]   ;;  %v3634_v60 = vld [vmem:[#allocation3 + $0x50c] ss:$16 sps:$4 sm:$0xff]  }
  0x93   :  { %1758 = vmatpush1.bf16.msra.mxu0 %v3545_v61  ;;  %1922 = vmatpush1.bf16.msra.mxu1 %v3548_v62  ;;  %v3629_v61 = vld [vmem:[#allocation3 + $0x500] ss:$16 sps:$4 sm:$0xff]   ;;  %v3632_v62 = vld [vmem:[#allocation3 + $0x508] ss:$16 sps:$4 sm:$0xff]  }
  0x94   :  { %1759 = vmatprep.subr.bf16.mxu0 %v3553_v63  ;;  %1923 = vmatprep.subr.bf16.mxu1 %v3556_v0  ;;  %v3637_v63 = vld [vmem:[#allocation3 + $0x524] ss:$16 sps:$4 sm:$0xff]   ;;  %v3640_v0 = vld [vmem:[#allocation3 + $0x52c] ss:$16 sps:$4 sm:$0xff]  }
  0x97   :  { %1760 = vmatpush1.bf16.msra.mxu0 %v3551_v1  ;;  %1924 = vmatpush1.bf16.msra.mxu1 %v3554_v2  ;;  %v3635_v1 = vld [vmem:[#allocation3 + $0x520] ss:$16 sps:$4 sm:$0xff]   ;;  %v3638_v2 = vld [vmem:[#allocation3 + $0x528] ss:$16 sps:$4 sm:$0xff]  }
  0x98   :  { %1761 = vmatprep.subr.bf16.mxu0 %v3559_v3  ;;  %1925 = vmatprep.subr.bf16.mxu1 %v3562_v4  ;;  %v3643_v3 = vld [vmem:[#allocation3 + $0x544] ss:$16 sps:$4 sm:$0xff]   ;;  %v3646_v4 = vld [vmem:[#allocation3 + $0x54c] ss:$16 sps:$4 sm:$0xff]  }
  0x9b   :  { %1762 = vmatpush1.bf16.msra.mxu0 %v3557_v5  ;;  %1926 = vmatpush1.bf16.msra.mxu1 %v3560_v6  ;;  %v3641_v5 = vld [vmem:[#allocation3 + $0x540] ss:$16 sps:$4 sm:$0xff]   ;;  %v3644_v6 = vld [vmem:[#allocation3 + $0x548] ss:$16 sps:$4 sm:$0xff]  }
  0x9c   :  { %1763 = vmatprep.subr.bf16.mxu0 %v3565_v7  ;;  %1927 = vmatprep.subr.bf16.mxu1 %v3568_v8  ;;  %v3649_v7 = vld [vmem:[#allocation3 + $0x564] ss:$16 sps:$4 sm:$0xff]   ;;  %v3652_v8 = vld [vmem:[#allocation3 + $0x56c] ss:$16 sps:$4 sm:$0xff]  }
  0x9f   :  { %1764 = vmatpush1.bf16.msra.mxu0 %v3563_v9  ;;  %1928 = vmatpush1.bf16.msra.mxu1 %v3566_v11  ;;  %v3647_v9 = vld [vmem:[#allocation3 + $0x560] ss:$16 sps:$4 sm:$0xff]   ;;  %v3650_v11 = vld [vmem:[#allocation3 + $0x568] ss:$16 sps:$4 sm:$0xff]  }
  0xa0   :  { %1765 = vmatprep.subr.bf16.mxu0 %v3571_v12  ;;  %1929 = vmatprep.subr.bf16.mxu1 %v3574_v13  ;;  %v3655_v12 = vld [vmem:[#allocation3 + $0x584] ss:$16 sps:$4 sm:$0xff]   ;;  %v3658_v13 = vld [vmem:[#allocation3 + $0x58c] ss:$16 sps:$4 sm:$0xff]  }
  0xa3   :  { %1766 = vmatpush1.bf16.msra.mxu0 %v3569_v14  ;;  %1930 = vmatpush1.bf16.msra.mxu1 %v3572_v15  ;;  %v3653_v14 = vld [vmem:[#allocation3 + $0x580] ss:$16 sps:$4 sm:$0xff]   ;;  %v3656_v15 = vld [vmem:[#allocation3 + $0x588] ss:$16 sps:$4 sm:$0xff]  }
  0xa4   :  { %1767 = vmatprep.subr.bf16.mxu0 %v3577_v16  ;;  %1931 = vmatprep.subr.bf16.mxu1 %v3580_v17  ;;  %v3661_v16 = vld [vmem:[#allocation3 + $0x5a4] ss:$16 sps:$4 sm:$0xff]   ;;  %v3664_v17 = vld [vmem:[#allocation3 + $0x5ac] ss:$16 sps:$4 sm:$0xff]  }
  0xa7   :  { %1768 = vmatpush1.bf16.msra.mxu0 %v3575_v18  ;;  %1932 = vmatpush1.bf16.msra.mxu1 %v3578_v19  ;;  %v3659_v18 = vld [vmem:[#allocation3 + $0x5a0] ss:$16 sps:$4 sm:$0xff]   ;;  %v3662_v19 = vld [vmem:[#allocation3 + $0x5a8] ss:$16 sps:$4 sm:$0xff]  }
  0xa8   :  { %1778 = vmatprep.subr.bf16.mxu0 %v3583_v20  ;;  %1942 = vmatprep.subr.bf16.mxu1 %v3586_v21  ;;  %v3667_v20 = vld [vmem:[#allocation3 + $0x5c4] ss:$16 sps:$4 sm:$0xff]   ;;  %v3670_v21 = vld [vmem:[#allocation3 + $0x5cc] ss:$16 sps:$4 sm:$0xff]  }
  0xaa   :  { %1770 = vmatmul.mubr.bf16.vlgmr.msra.gmra.mrb[0].mxu0 %v132_v23  ;;  %1934 = vmatmul.mubr.bf16.vlgmr.msra.gmra.mrb[0].mxu1 %v132_v23  ;;  %v105_v23 = vcombine.high %v4025_v25, %v4025_v25 }
  0xab   :  { %1779 = vmatpush1.bf16.msra.mxu0 %v3581_v22  ;;  %1943 = vmatpush1.bf16.msra.mxu1 %v3584_v24  ;;  %v3665_v22 = vld [vmem:[#allocation3 + $0x5c0] ss:$16 sps:$4 sm:$0xff]   ;;  %v3668_v24 = vld [vmem:[#allocation3 + $0x5c8] ss:$16 sps:$4 sm:$0xff]  }
  0xac   :  { %1780 = vmatprep.subr.bf16.mxu0 %v3589_v26  ;;  %1944 = vmatprep.subr.bf16.mxu1 %v3592_v27  ;;  %v3673_v26 = vld [vmem:[#allocation3 + $0x5e4] ss:$16 sps:$4 sm:$0xff]   ;;  %v3676_v27 = vld [vmem:[#allocation3 + $0x5ec] ss:$16 sps:$4 sm:$0xff]  }
  0xad   :  { %1810 = vmatprep.mubr.bf16.mxu0 %v135_v33  ;;  %1974 = vmatprep.mubr.bf16.mxu1 %v135_v33  ;;  %v3677_v33 = vld [vmem:[#allocation3 + $0x600] ss:$16 sps:$4 sm:$0xff]  }
  0xaf   :  { %1781 = vmatpush1.bf16.msra.mxu0 %v3587_v29  ;;  %1945 = vmatpush1.bf16.msra.mxu1 %v3590_v30  ;;  %v4036_v29 = vrot.slane %v105_v23, %v4009_v50  ;;  %v3674_v30 = vld [vmem:[#allocation3 + $0x5e8] ss:$16 sps:$4 sm:$0xff]   ;;  %v3688_v50 = vld [vmem:[#allocation3 + $0x62c] ss:$16 sps:$4 sm:$0xff]   ;;  %v3757_v23 = vld [vmem:[#allocation3 + $0x7a4] ss:$16 sps:$4 sm:$0xff]  }
  0xb0   :  { %1782 = vmatprep.subr.bf16.mxu0 %v3595_v31  ;;  %1946 = vmatprep.subr.bf16.mxu1 %v3598_v32  ;;  %v3679_v31 = vld [vmem:[#allocation3 + $0x604] ss:$16 sps:$4 sm:$0xff]   ;;  %v3682_v32 = vld [vmem:[#allocation3 + $0x60c] ss:$16 sps:$4 sm:$0xff]  }
  0xb1   :  { %v121_v25 = vcombine.high %v4036_v29, %v4036_v29 }
  0xb3   :  { %1783 = vmatpush1.bf16.msra.mxu0 %v3593_v34  ;;  %1947 = vmatpush1.bf16.msra.mxu1 %v3596_v35  ;;  %v3680_v34 = vld [vmem:[#allocation3 + $0x608] ss:$16 sps:$4 sm:$0xff]   ;;  %v134_v35 = vpack.c.bf16 %v4029_v28, %v4029_v28  ;;  %v3697_v28 = vld [vmem:[#allocation3 + $0x664] ss:$16 sps:$4 sm:$0xff]  }
  0xb4   :  { %1784 = vmatprep.subr.bf16.mxu0 %v3601_v36  ;;  %1948 = vmatprep.subr.bf16.mxu1 %v3604_v37  ;;  %v3685_v36 = vld [vmem:[#allocation3 + $0x624] ss:$16 sps:$4 sm:$0xff]   ;;  %v3683_v37 = vld [vmem:[#allocation3 + $0x620] ss:$16 sps:$4 sm:$0xff]  }
  0xb7   :  { %1785 = vmatpush1.bf16.msra.mxu0 %v3599_v38  ;;  %1949 = vmatpush1.bf16.msra.mxu1 %v3602_v40  ;;  %v3686_v38 = vld [vmem:[#allocation3 + $0x628] ss:$16 sps:$4 sm:$0xff]   ;;  %v137_v40 = vpack.c.bf16 %v121_v25, %v121_v25  ;;  %v3772_v25 = vld [vmem:[#allocation3 + $0x7ec] ss:$16 sps:$4 sm:$0xff]  }
  0xb8   :  { %1786 = vmatprep.subr.bf16.mxu0 %v3607_v41  ;;  %1950 = vmatprep.subr.bf16.mxu1 %v3610_v42  ;;  %v3691_v41 = vld [vmem:[#allocation3 + $0x644] ss:$16 sps:$4 sm:$0xff]   ;;  %v3694_v42 = vld [vmem:[#allocation3 + $0x64c] ss:$16 sps:$4 sm:$0xff]  }
  0xbb   :  { %1787 = vmatpush1.bf16.msra.mxu0 %v3605_v43  ;;  %1951 = vmatpush1.bf16.msra.mxu1 %v3608_v45  ;;  %v3689_v43 = vld [vmem:[#allocation3 + $0x640] ss:$16 sps:$4 sm:$0xff]   ;;  %v3692_v45 = vld [vmem:[#allocation3 + $0x648] ss:$16 sps:$4 sm:$0xff]  }
  0xbc   :  { %1788 = vmatprep.subr.bf16.mxu0 %v3613_v46  ;;  %1952 = vmatprep.subr.bf16.mxu1 %v3616_v47  ;;  %v3700_v46 = vld [vmem:[#allocation3 + $0x66c] ss:$16 sps:$4 sm:$0xff]   ;;  %v3695_v47 = vld [vmem:[#allocation3 + $0x660] ss:$16 sps:$4 sm:$0xff]  }
  0xbf   :  { %1789 = vmatpush1.bf16.msra.mxu0 %v3611_v48  ;;  %1953 = vmatpush1.bf16.msra.mxu1 %v3614_v49  ;;  %v3698_v48 = vld [vmem:[#allocation3 + $0x668] ss:$16 sps:$4 sm:$0xff]   ;;  %v3703_v49 = vld [vmem:[#allocation3 + $0x684] ss:$16 sps:$4 sm:$0xff]  }
  0xc0   :  { %1790 = vmatprep.subr.bf16.mxu0 %v3619_v51  ;;  %1954 = vmatprep.subr.bf16.mxu1 %v3622_v52  ;;  %v3706_v51 = vld [vmem:[#allocation3 + $0x68c] ss:$16 sps:$4 sm:$0xff]   ;;  %v3701_v52 = vld [vmem:[#allocation3 + $0x680] ss:$16 sps:$4 sm:$0xff]  }
  0xc3   :  { %1791 = vmatpush1.bf16.msra.mxu0 %v3617_v53  ;;  %1955 = vmatpush1.bf16.msra.mxu1 %v3620_v54  ;;  %v3704_v53 = vld [vmem:[#allocation3 + $0x688] ss:$16 sps:$4 sm:$0xff]   ;;  %v3709_v54 = vld [vmem:[#allocation3 + $0x6a4] ss:$16 sps:$4 sm:$0xff]  }
  0xc4   :  { %1792 = vmatprep.subr.bf16.mxu0 %v3625_v55  ;;  %1956 = vmatprep.subr.bf16.mxu1 %v3628_v56  ;;  %v3712_v55 = vld [vmem:[#allocation3 + $0x6ac] ss:$16 sps:$4 sm:$0xff]   ;;  %v3707_v56 = vld [vmem:[#allocation3 + $0x6a0] ss:$16 sps:$4 sm:$0xff]  }
  0xc7   :  { %1793 = vmatpush1.bf16.msra.mxu0 %v3623_v57  ;;  %1957 = vmatpush1.bf16.msra.mxu1 %v3626_v58  ;;  %v3710_v57 = vld [vmem:[#allocation3 + $0x6a8] ss:$16 sps:$4 sm:$0xff]   ;;  %v3715_v58 = vld [vmem:[#allocation3 + $0x6c4] ss:$16 sps:$4 sm:$0xff]  }
  0xc8   :  { %1794 = vmatprep.subr.bf16.mxu0 %v3631_v59  ;;  %1958 = vmatprep.subr.bf16.mxu1 %v3634_v60  ;;  %v3718_v59 = vld [vmem:[#allocation3 + $0x6cc] ss:$16 sps:$4 sm:$0xff]   ;;  %v3713_v60 = vld [vmem:[#allocation3 + $0x6c0] ss:$16 sps:$4 sm:$0xff]  }
  0xcb   :  { %1795 = vmatpush1.bf16.msra.mxu0 %v3629_v61  ;;  %1959 = vmatpush1.bf16.msra.mxu1 %v3632_v62  ;;  %v3716_v61 = vld [vmem:[#allocation3 + $0x6c8] ss:$16 sps:$4 sm:$0xff]   ;;  %v3721_v62 = vld [vmem:[#allocation3 + $0x6e4] ss:$16 sps:$4 sm:$0xff]  }
  0xcc   :  { %1796 = vmatprep.subr.bf16.mxu0 %v3637_v63  ;;  %1960 = vmatprep.subr.bf16.mxu1 %v3640_v0  ;;  %v3724_v63 = vld [vmem:[#allocation3 + $0x6ec] ss:$16 sps:$4 sm:$0xff]   ;;  %v3719_v0 = vld [vmem:[#allocation3 + $0x6e0] ss:$16 sps:$4 sm:$0xff]  }
  0xcf   :  { %1797 = vmatpush1.bf16.msra.mxu0 %v3635_v1  ;;  %1961 = vmatpush1.bf16.msra.mxu1 %v3638_v2  ;;  %v3722_v1 = vld [vmem:[#allocation3 + $0x6e8] ss:$16 sps:$4 sm:$0xff]   ;;  %v3727_v2 = vld [vmem:[#allocation3 + $0x704] ss:$16 sps:$4 sm:$0xff]  }
  0xd0   :  { %1798 = vmatprep.subr.bf16.mxu0 %v3643_v3  ;;  %1962 = vmatprep.subr.bf16.mxu1 %v3646_v4  ;;  %v3730_v3 = vld [vmem:[#allocation3 + $0x70c] ss:$16 sps:$4 sm:$0xff]   ;;  %v3725_v4 = vld [vmem:[#allocation3 + $0x700] ss:$16 sps:$4 sm:$0xff]  }
  0xd3   :  { %1799 = vmatpush1.bf16.msra.mxu0 %v3641_v5  ;;  %1963 = vmatpush1.bf16.msra.mxu1 %v3644_v6  ;;  %v3728_v5 = vld [vmem:[#allocation3 + $0x708] ss:$16 sps:$4 sm:$0xff]   ;;  %v3733_v6 = vld [vmem:[#allocation3 + $0x724] ss:$16 sps:$4 sm:$0xff]  }
  0xd4   :  { %1800 = vmatprep.subr.bf16.mxu0 %v3649_v7  ;;  %1964 = vmatprep.subr.bf16.mxu1 %v3652_v8  ;;  %v3736_v7 = vld [vmem:[#allocation3 + $0x72c] ss:$16 sps:$4 sm:$0xff]   ;;  %v3731_v8 = vld [vmem:[#allocation3 + $0x720] ss:$16 sps:$4 sm:$0xff]  }
  0xd7   :  { %1801 = vmatpush1.bf16.msra.mxu0 %v3647_v9  ;;  %1965 = vmatpush1.bf16.msra.mxu1 %v3650_v11  ;;  %v3734_v9 = vld [vmem:[#allocation3 + $0x728] ss:$16 sps:$4 sm:$0xff]   ;;  %v3739_v11 = vld [vmem:[#allocation3 + $0x744] ss:$16 sps:$4 sm:$0xff]  }
  0xd8   :  { %1802 = vmatprep.subr.bf16.mxu0 %v3655_v12  ;;  %1966 = vmatprep.subr.bf16.mxu1 %v3658_v13  ;;  %v3742_v12 = vld [vmem:[#allocation3 + $0x74c] ss:$16 sps:$4 sm:$0xff]   ;;  %v3737_v13 = vld [vmem:[#allocation3 + $0x740] ss:$16 sps:$4 sm:$0xff]  }
  0xdb   :  { %1803 = vmatpush1.bf16.msra.mxu0 %v3653_v14  ;;  %1967 = vmatpush1.bf16.msra.mxu1 %v3656_v15  ;;  %v3740_v14 = vld [vmem:[#allocation3 + $0x748] ss:$16 sps:$4 sm:$0xff]   ;;  %v3745_v15 = vld [vmem:[#allocation3 + $0x764] ss:$16 sps:$4 sm:$0xff]  }
  0xdc   :  { %1804 = vmatprep.subr.bf16.mxu0 %v3661_v16  ;;  %1968 = vmatprep.subr.bf16.mxu1 %v3664_v17  ;;  %v3748_v16 = vld [vmem:[#allocation3 + $0x76c] ss:$16 sps:$4 sm:$0xff]   ;;  %v3743_v17 = vld [vmem:[#allocation3 + $0x760] ss:$16 sps:$4 sm:$0xff]  }
  0xdf   :  { %1805 = vmatpush1.bf16.msra.mxu0 %v3659_v18  ;;  %1969 = vmatpush1.bf16.msra.mxu1 %v3662_v19  ;;  %v3746_v18 = vld [vmem:[#allocation3 + $0x768] ss:$16 sps:$4 sm:$0xff]   ;;  %v3751_v19 = vld [vmem:[#allocation3 + $0x784] ss:$16 sps:$4 sm:$0xff]  }
  0xe0   :  { %1806 = vmatprep.subr.bf16.mxu0 %v3667_v20  ;;  %1970 = vmatprep.subr.bf16.mxu1 %v3670_v21  ;;  %v3754_v20 = vld [vmem:[#allocation3 + $0x78c] ss:$16 sps:$4 sm:$0xff]   ;;  %v3749_v21 = vld [vmem:[#allocation3 + $0x780] ss:$16 sps:$4 sm:$0xff]  }
  0xe3   :  { %1807 = vmatpush1.bf16.msra.mxu0 %v3665_v22  ;;  %1971 = vmatpush1.bf16.msra.mxu1 %v3668_v24  ;;  %v3752_v22 = vld [vmem:[#allocation3 + $0x788] ss:$16 sps:$4 sm:$0xff]   ;;  %v3760_v24 = vld [vmem:[#allocation3 + $0x7ac] ss:$16 sps:$4 sm:$0xff]  }
  0xe4   :  { %1808 = vmatprep.subr.bf16.mxu0 %v3673_v26  ;;  %1972 = vmatprep.subr.bf16.mxu1 %v3676_v27  ;;  %v3755_v26 = vld [vmem:[#allocation3 + $0x7a0] ss:$16 sps:$4 sm:$0xff]   ;;  %v3758_v27 = vld [vmem:[#allocation3 + $0x7a8] ss:$16 sps:$4 sm:$0xff]  }
  0xe7   :  { %1809 = vmatpush1.bf16.msra.mxu0 %v3671_v10  ;;  %1973 = vmatpush1.bf16.msra.mxu1 %v3674_v30  ;;  %v3763_v10 = vld [vmem:[#allocation3 + $0x7c4] ss:$16 sps:$4 sm:$0xff]   ;;  %v3766_v30 = vld [vmem:[#allocation3 + $0x7cc] ss:$16 sps:$4 sm:$0xff]  }
  0xe8   :  { %1819 = vmatprep.subr.bf16.mxu0 %v3679_v31  ;;  %1983 = vmatprep.subr.bf16.mxu1 %v3682_v32  ;;  %v3761_v31 = vld [vmem:[#allocation3 + $0x7c0] ss:$16 sps:$4 sm:$0xff]   ;;  %v3764_v32 = vld [vmem:[#allocation3 + $0x7c8] ss:$16 sps:$4 sm:$0xff]  }
  0xea   :  { %1811 = vmatmul.mubr.bf16.vlgmr.msra.gmra.mrb[0].mxu0 %v134_v35  ;;  %1975 = vmatmul.mubr.bf16.vlgmr.msra.gmra.mrb[0].mxu1 %v134_v35  ;;  %v3770_v35 = vld [vmem:[#allocation3 + $0x7e8] ss:$16 sps:$4 sm:$0xff]  }
  0xeb   :  { %1820 = vmatpush1.bf16.msra.mxu0 %v3677_v33  ;;  %1984 = vmatpush1.bf16.msra.mxu1 %v3680_v34  ;;  %v3769_v33 = vld [vmem:[#allocation3 + $0x7e4] ss:$16 sps:$4 sm:$0xff]   ;;  %v3767_v34 = vld [vmem:[#allocation3 + $0x7e0] ss:$16 sps:$4 sm:$0xff]  }
  0xec   :  { %1821 = vmatprep.subr.bf16.mxu0 %v3685_v36  ;;  %1985 = vmatprep.subr.bf16.mxu1 %v3688_v50  ;;  %v3774_v36 = vld [vmem:[#allocation5 + $0x40] sm:$0xff]  }
  0xed   :  { %1851 = vmatprep.mubr.bf16.mxu0 %v137_v40  ;;  %2015 = vmatprep.mubr.bf16.mxu1 %v137_v40  ;;  %v3775_v50 = vld [vmem:[#allocation5 + $0xc0] sm:$0xff]  }
  0xee   :  { %v3777_v40 = vld [vmem:[#allocation5 + $0x80] sm:$0xff]  }
  0xef   :  { %1822 = vmatpush1.bf16.msra.mxu0 %v3683_v37  ;;  %1986 = vmatpush1.bf16.msra.mxu1 %v3686_v38  ;;  %v136_v37 = vpack.c.bf16 %v4036_v29, %v4036_v29  ;;  %v3776_v38 = vld [vmem:[#allocation5] sm:$0xff]   ;;  %v3784_v29 = vld [vmem:[#allocation5 + $0x10] sm:$0xff]  }
  0xf0   :  { %1823 = vmatprep.subr.bf16.mxu0 %v3691_v41  ;;  %1987 = vmatprep.subr.bf16.mxu1 %v3694_v42  ;;  %v3778_v41 = vld [vmem:[#allocation5 + $0x48] sm:$0xff]  }
  0xf1   :  { %v3779_v42 = vld [vmem:[#allocation5 + $0xc8] sm:$0xff]  }
  0xf3   :  { %1824 = vmatpush1.bf16.msra.mxu0 %v3689_v43  ;;  %1988 = vmatpush1.bf16.msra.mxu1 %v3692_v45  ;;  %v3780_v43 = vld [vmem:[#allocation5 + $0x8] sm:$0xff]  }
  0xf4   :  { %1825 = vmatprep.subr.bf16.mxu0 %v3697_v28  ;;  %1989 = vmatprep.subr.bf16.mxu1 %v3700_v46  ;;  %v3781_v45 = vld [vmem:[#allocation5 + $0x88] sm:$0xff]   ;;  %v3782_v28 = vld [vmem:[#allocation5 + $0x50] sm:$0xff]  }
  0xf5   :  { %v3783_v46 = vld [vmem:[#allocation5 + $0xd0] sm:$0xff]  }
  0xf7   :  { %1826 = vmatpush1.bf16.msra.mxu0 %v3695_v47  ;;  %1990 = vmatpush1.bf16.msra.mxu1 %v3698_v48  ;;  %v3785_v47 = vld [vmem:[#allocation5 + $0x90] sm:$0xff]   ;;  %v3786_v48 = vld [vmem:[#allocation5 + $0x58] sm:$0xff]  }
  0xf8   :  { %1827 = vmatprep.subr.bf16.mxu0 %v3703_v49  ;;  %1991 = vmatprep.subr.bf16.mxu1 %v3706_v51  ;;  %v3787_v49 = vld [vmem:[#allocation5 + $0xd8] sm:$0xff]  }
  0xf9   :  { %v3788_v51 = vld [vmem:[#allocation5 + $0x18] sm:$0xff]  }
  0xfb   :  { %1828 = vmatpush1.bf16.msra.mxu0 %v3701_v52  ;;  %1992 = vmatpush1.bf16.msra.mxu1 %v3704_v53  ;;  %v3789_v52 = vld [vmem:[#allocation5 + $0x98] sm:$0xff]   ;;  %v3790_v53 = vld [vmem:[#allocation5 + $0x60] sm:$0xff]  }
  0xfc   :  { %1829 = vmatprep.subr.bf16.mxu0 %v3709_v54  ;;  %1993 = vmatprep.subr.bf16.mxu1 %v3712_v55  ;;  %v3791_v54 = vld [vmem:[#allocation5 + $0xe0] sm:$0xff]  }
  0xfd   :  { %v3792_v55 = vld [vmem:[#allocation5 + $0x20] sm:$0xff]  }
  0xff   :  { %1830 = vmatpush1.bf16.msra.mxu0 %v3707_v56  ;;  %1994 = vmatpush1.bf16.msra.mxu1 %v3710_v57  ;;  %v3793_v56 = vld [vmem:[#allocation5 + $0xa0] sm:$0xff]   ;;  %v3794_v57 = vld [vmem:[#allocation5 + $0x68] sm:$0xff]  }
 0x100   :  { %1831 = vmatprep.subr.bf16.mxu0 %v3715_v58  ;;  %1995 = vmatprep.subr.bf16.mxu1 %v3718_v59  ;;  %v3795_v58 = vld [vmem:[#allocation5 + $0xe8] sm:$0xff]  }
 0x101   :  { %v3796_v59 = vld [vmem:[#allocation5 + $0x28] sm:$0xff]  }
 0x103   :  { %1832 = vmatpush1.bf16.msra.mxu0 %v3713_v60  ;;  %1996 = vmatpush1.bf16.msra.mxu1 %v3716_v61  ;;  %v3797_v60 = vld [vmem:[#allocation5 + $0xa8] sm:$0xff]   ;;  %v3798_v61 = vld [vmem:[#allocation5 + $0x70] sm:$0xff]  }
 0x104   :  { %1833 = vmatprep.subr.bf16.mxu0 %v3721_v62  ;;  %1997 = vmatprep.subr.bf16.mxu1 %v3724_v63  ;;  %v3799_v62 = vld [vmem:[#allocation5 + $0xf0] sm:$0xff]  }
 0x105   :  { %v3800_v63 = vld [vmem:[#allocation5 + $0x30] sm:$0xff]  }
 0x107   :  { %1834 = vmatpush1.bf16.msra.mxu0 %v3719_v0  ;;  %1998 = vmatpush1.bf16.msra.mxu1 %v3722_v1  ;;  %v3801_v0 = vld [vmem:[#allocation5 + $0xb0] sm:$0xff]   ;;  %v3802_v1 = vld [vmem:[#allocation5 + $0x78] sm:$0xff]  }
 0x108   :  { %1835 = vmatprep.subr.bf16.mxu0 %v3727_v2  ;;  %1999 = vmatprep.subr.bf16.mxu1 %v3730_v3  ;;  %v3803_v2 = vld [vmem:[#allocation5 + $0xf8] sm:$0xff]  }
 0x109   :  { %v3804_v3 = vld [vmem:[#allocation5 + $0x38] sm:$0xff]  }
 0x10b   :  { %1836 = vmatpush1.bf16.msra.mxu0 %v3725_v4  ;;  %2000 = vmatpush1.bf16.msra.mxu1 %v3728_v5  ;;  %v3805_v4 = vld [vmem:[#allocation5 + $0xb8] sm:$0xff]   ;;  %v3889_v5 = vmov 0.0  }
 0x10c   :  { %1837 = vmatprep.subr.bf16.mxu0 %v3733_v6  ;;  %2001 = vmatprep.subr.bf16.mxu1 %v3736_v7  ;;  %v398_v6 = vsub.s32 0, %v4006_v44  ;;  %v406_v7 = vsub.s32 2, %v4006_v44 }
 0x10f   :  { %1838 = vmatpush1.bf16.msra.mxu0 %v3731_v8  ;;  %2002 = vmatpush1.bf16.msra.mxu1 %v3734_v9  ;;  %v394_v8 = vld [vmem:[%s4185_s2] sm:$0xf]  ;;  %v402_v9 = vsub.s32 1, %v4006_v44 }
 0x110   :  { %1839 = vmatprep.subr.bf16.mxu0 %v3739_v11  ;;  %2003 = vmatprep.subr.bf16.mxu1 %v3742_v12  ;;  %v410_v11 = vsub.s32 3, %v4006_v44  ;;  %v399_v12 = vrot.slane %v394_v8, %v398_v6  ;;  %v3814_v6 = vld [vmem:[%s4191_s8] sm:$0xff]  }
 0x113   :  { %1840 = vmatpush1.bf16.msra.mxu0 %v3737_v13  ;;  %2004 = vmatpush1.bf16.msra.mxu1 %v3740_v14  ;;  %v407_v13 = vrot.slane %v394_v8, %v406_v7  ;;  %v403_v14 = vrot.slane %v394_v8, %v402_v9 }
 0x114   :  { %1841 = vmatprep.subr.bf16.mxu0 %v3745_v15  ;;  %2005 = vmatprep.subr.bf16.mxu1 %v3748_v16  ;;  %v411_v15 = vrot.slane %v394_v8, %v410_v11  ;;  %v3815_v8 = vld [vmem:[%s4191_s8 + $0x8] sm:$0xff]   ;;  %v3184_v11 = vld [vmem:[%s4190_s7] ss:$0 sm:$0xff]  ;;  %s3892_s8 = smov 12  }
 0x117   :  { %1842 = vmatpush1.bf16.msra.mxu0 %v3743_v17  ;;  %2006 = vmatpush1.bf16.msra.mxu1 %v3746_v18 }
 0x118   :  { %1843 = vmatprep.subr.bf16.mxu0 %v3751_v19  ;;  %2007 = vmatprep.subr.bf16.mxu1 %v3754_v20 }
 0x11b   :  { %1844 = vmatpush1.bf16.msra.mxu0 %v3749_v21  ;;  %2008 = vmatpush1.bf16.msra.mxu1 %v3752_v22 }
 0x11c   :  { %1845 = vmatprep.subr.bf16.mxu0 %v3757_v23  ;;  %2009 = vmatprep.subr.bf16.mxu1 %v3760_v24 }
 0x11f   :  { %1846 = vmatpush1.bf16.msra.mxu0 %v3755_v26  ;;  %2010 = vmatpush1.bf16.msra.mxu1 %v3758_v27 }
 0x120   :  { %1847 = vmatprep.subr.bf16.mxu0 %v3763_v10  ;;  %2011 = vmatprep.subr.bf16.mxu1 %v3766_v30 }
 0x123   :  { %1848 = vmatpush1.bf16.msra.mxu0 %v3761_v31  ;;  %2012 = vmatpush1.bf16.msra.mxu1 %v3764_v32 }
 0x124   :  { %1849 = vmatprep.subr.bf16.mxu0 %v3769_v33  ;;  %2013 = vmatprep.subr.bf16.mxu1 %v3772_v25 }
 0x127   :  { %1850 = vmatpush1.bf16.msra.mxu0 %v3767_v34  ;;  %2014 = vmatpush1.bf16.msra.mxu1 %v3770_v35  ;;  %v3806_v34 = vld [vmem:[%s4188_s5] sm:$0xff]  }
 0x128   :  { %3206 = vmatprep.subr.bf16.mxu0 %v3774_v36  ;;  %3228 = vmatprep.subr.bf16.mxu1 %v3775_v50  ;;  %v3807_v50 = vld [vmem:[%s4188_s5 + $0x8] sm:$0xff]  }
 0x12a   :  { %1852 = vmatmul.mubr.bf16.vlgmr.msra.gmra.mrb[0].mxu0 %v136_v37  ;;  %2016 = vmatmul.mubr.bf16.vlgmr.msra.gmra.mrb[0].mxu1 %v136_v37  ;;  %v3808_v37 = vld [vmem:[%s4188_s5 + $0x10] sm:$0xff]  }
 0x12b   :  { %3207 = vmatpush3.bf16.msra.mxu0 %v3776_v38  ;;  %3229 = vmatpush3.bf16.msra.mxu1 %v3777_v40  ;;  %v3809_v38 = vld [vmem:[%s4188_s5 + $0x18] sm:$0xff]   ;;  %v3810_v40 = vld [vmem:[%s4188_s5 + $0x20] sm:$0xff]  }
 0x12c   :  { %3208 = vmatprep.subr.bf16.mxu0 %v3778_v41  ;;  %3230 = vmatprep.subr.bf16.mxu1 %v3779_v42  ;;  %v3811_v41 = vld [vmem:[%s4188_s5 + $0x28] sm:$0xff]   ;;  %v3890_v42 = vmov 65535  }
 0x12f   :  { %3209 = vmatpush3.bf16.msra.mxu0 %v3780_v43  ;;  %3231 = vmatpush3.bf16.msra.mxu1 %v3781_v45  ;;  %v2402_v43 = vsel %vm2400_vm0, 4294967295, %v3890_v42  ;;  %v2395_v45 = vld [vmem:[%s4189_s6] sm:$0x3] }
 0x130   :  { %3210 = vmatprep.subr.bf16.mxu0 %v3782_v28  ;;  %3232 = vmatprep.subr.bf16.mxu1 %v3783_v46  ;;  %v2403_v28 = vsel %vm2401_vm1, %v2402_v43, 0  ;;  %v3812_v46 = vld [vmem:[%s4188_s5 + $0x30] sm:$0xff]  }
 0x133   :  { %3211 = vmatpush3.bf16.msra.mxu0 %v3784_v29  ;;  %3233 = vmatpush3.bf16.msra.mxu1 %v3785_v47  ;;  %v2405_v29 = vand.u32 %v2403_v28, %v2395_v45  ;;  %v2393_v47 = vld [vmem:[%s4202_s19 + $0x10] sm:$0x3]  ;;  %v3827_v45 = vld [vmem:[%s4197_s14 + $0x8] sm:$0xff]  }
 0x134   :  { %3212 = vmatprep.subr.bf16.mxu0 %v3786_v48  ;;  %3234 = vmatprep.subr.bf16.mxu1 %v3787_v49  ;;  %v2394_v48 = vpack.c.bf16 %v2393_v47, %v2393_v47  ;;  %v3813_v49 = vld [vmem:[%s4188_s5 + $0x38] sm:$0xff]  }
 0x137   :  { %3213 = vmatpush3.bf16.msra.mxu0 %v3788_v51  ;;  %3235 = vmatpush3.bf16.msra.mxu1 %v3789_v52 }
 0x138   :  { %3214 = vmatprep.subr.bf16.mxu0 %v3790_v53  ;;  %3236 = vmatprep.subr.bf16.mxu1 %v3791_v54  ;;  %v3142_v53 = vld [vmem:[%s4187_s4] ss:$0 sm:$0xff] }
 0x13b   :  { %3215 = vmatpush3.bf16.msra.mxu0 %v3792_v55  ;;  %3237 = vmatpush3.bf16.msra.mxu1 %v3793_v56 }
 0x13c   :  { %3216 = vmatprep.subr.bf16.mxu0 %v3794_v57  ;;  %3238 = vmatprep.subr.bf16.mxu1 %v3795_v58 }
 0x13f   :  { %3217 = vmatpush3.bf16.msra.mxu0 %v3796_v59  ;;  %3239 = vmatpush3.bf16.msra.mxu1 %v3797_v60 }
 0x140   :  { %3218 = vmatprep.subr.bf16.mxu0 %v3798_v61  ;;  %3240 = vmatprep.subr.bf16.mxu1 %v3799_v62 }
 0x143   :  { %3219 = vmatpush3.bf16.msra.mxu0 %v3800_v63  ;;  %3241 = vmatpush3.bf16.msra.mxu1 %v3801_v0 }
 0x144   :  { %3220 = vmatprep.subr.bf16.mxu0 %v3802_v1  ;;  %3242 = vmatprep.subr.bf16.mxu1 %v3803_v2 }
 0x147   :  { %3221 = vmatpush3.bf16.msra.mxu0 %v3804_v3  ;;  %3243 = vmatpush3.bf16.msra.mxu1 %v3805_v4 }
 0x148   :  { %3285 = vmatprep.subr.bf16.mxu1 %v3889_v5  ;;  %3279 = vmatprep.subr.bf16.mxu0 %v3889_v5 }
 0x1fd   :  { %v1853_v16 = vpop.f32.mrb[0].mxu0  ;;  %v2017_v17 = vpop.f32.mrb[0].mxu1 }
 0x1fe   :  { %v3349_v18 = vadd.f32 %v1853_v16, %v399_v12  ;;  %v3351_v19 = vadd.f32 %v2017_v17, %v407_v13  ;;  %v1855_v20 = vpop.f32.mrb[1].mxu0  ;;  %v2019_v21 = vpop.f32.mrb[1].mxu1 }
 0x1ff   :  { %v3350_v22 = vadd.f32 %v1855_v20, %v403_v14  ;;  %v3352_v23 = vadd.f32 %v2019_v21, %v411_v15  ;;  %v1857_v24 = vpop.f32.mrb[2].mxu0  ;;  %v2021_v26 = vpop.f32.mrb[2].mxu1  ;;  %v3817_v20 = vld [vmem:[%s4193_s10 + $0x8] sm:$0xff]   ;;  %v3818_v21 = vld [vmem:[%s4193_s10 + $0x10] sm:$0xff]  }
 0x200   :  { %v2024_v27 = vmax.f32 %v3349_v18, 0.0  ;;  %v2026_v10 = vmax.f32 %v3351_v19, 0.0  ;;  %v1858_v30 = vpop.f32.mrb[3].mxu0  ;;  %v2022_v31 = vpop.f32.mrb[3].mxu1  ;;  %v3816_v18 = vld [vmem:[%s4193_s10] sm:$0xff]   ;;  %v3821_v24 = vld [vmem:[%s4193_s10 + $0x28] sm:$0xff]  }
 0x201   :  { %v2025_v32 = vmax.f32 %v3350_v22, 0.0  ;;  %v2027_v44 = vmax.f32 %v3352_v23, 0.0  ;;  %v3819_v22 = vld [vmem:[%s4193_s10 + $0x18] sm:$0xff]   ;;  %v3820_v23 = vld [vmem:[%s4193_s10 + $0x20] sm:$0xff]   ;;  %v3822_v26 = vld [vmem:[%s4193_s10 + $0x30] sm:$0xff]  }
 0x202   :  { %v2028_v35 = vpack.c.bf16 %v2024_v27, %v2024_v27  ;;  %v2030_v36 = vpack.c.bf16 %v2026_v10, %v2026_v10  ;;  %v3823_v27 = vld [vmem:[%s4193_s10 + $0x38] sm:$0xff]   ;;  %v3824_v10 = vld [vmem:[%s4195_s12] sm:$0xff]   ;;  %v3825_v30 = vld [vmem:[%s4195_s12 + $0x8] sm:$0xff]  }
 0x203   :  { %v2029_v33 = vpack.c.bf16 %v2025_v32, %v2025_v32  ;;  %v2031_v25 = vpack.c.bf16 %v2027_v44, %v2027_v44 }
 0x205   :  { %2327 = vmatprep.mubr.bf16.mxu0 %v2029_v33  ;;  %2367 = vmatprep.mubr.bf16.mxu1 %v2031_v25  ;;  %v3189_v25 = vld [vmem:[%s4194_s11] ss:$0 sm:$0xff] }
 0x206   :  { %2328 = vmatmul.mubr.bf16.vlgmr.msra.gmra.mrb[4].mxu0 %v2028_v35  ;;  %2368 = vmatmul.mubr.bf16.vlgmr.msra.gmra.mrb[4].mxu1 %v2030_v36 }
 0x207   :  { %3286 = vmatpush3.bf16.msra.mxu1 %v3806_v34  ;;  %3280 = vmatpush3.bf16.msra.mxu0 %v2405_v29  ;;  %v3198_v29 = vld [vmem:[#allocation2] ss:$0 sm:$0xff] }
 0x208   :  { %3287 = vmatprep.subr.bf16.mxu1 %v3889_v5  ;;  %3305 = vmatprep.subr.bf16.mxu0 %v3889_v5 }
 0x209   :  { %3281 = vmatprep.mubr.msk.bf16.mxu0 %vm3891_vm2, %v3889_v5  ;;  %3301 = vmatprep.mubr.msk.bf16.mxu1 %vm3891_vm2, %v3889_v5 }
 0x20b   :  { %3288 = vmatpush3.bf16.msra.mxu1 %v3807_v50  ;;  %v3185_v50 = vld [vmem:[%s4192_s9] ss:$0 sm:$0xff] }
 0x20c   :  { %3289 = vmatprep.subr.bf16.mxu1 %v3889_v5 }
 0x20e   :  { %3282 = vmatmul.mubr.msk.bf16.vlgmr.msra.gmra.mrb[8].mxu0 %vm2396_vm3, %v2394_v48 }
 0x20f   :  { %3290 = vmatpush3.bf16.msra.mxu1 %v3808_v37  ;;  %3309 = vmatprep.mubr.msk.bf16.mxu0 %vm3891_vm2, %v3889_v5 }
 0x210   :  { %3291 = vmatprep.subr.bf16.mxu1 %v3889_v5  ;;  %3306 = vmatpush3.bf16.msra.mxu0 %v3814_v6 }
 0x211   :  { %3307 = vmatprep.subr.bf16.mxu0 %v3889_v5 }
 0x213   :  { %3292 = vmatpush3.bf16.msra.mxu1 %v3809_v38 }
 0x214   :  { %3293 = vmatprep.subr.bf16.mxu1 %v3889_v5  ;;  %3308 = vmatpush3.bf16.msra.mxu0 %v3815_v8 }
 0x215   :  { %3313 = vmatprep.subr.bf16.mxu0 %v3889_v5 }
 0x217   :  { %3294 = vmatpush3.bf16.msra.mxu1 %v3810_v40 }
 0x218   :  { %3295 = vmatprep.subr.bf16.mxu1 %v3889_v5 }
 0x21b   :  { %3296 = vmatpush3.bf16.msra.mxu1 %v3811_v41  ;;  %v3826_v41 = vld [vmem:[%s4197_s14] sm:$0xff]  }
 0x21c   :  { %3297 = vmatprep.subr.bf16.mxu1 %v3889_v5 }
 0x21f   :  { %3298 = vmatpush3.bf16.msra.mxu1 %v3812_v46 }
 0x220   :  { %3299 = vmatprep.subr.bf16.mxu1 %v3889_v5 }
 0x223   :  { %3300 = vmatpush3.bf16.msra.mxu1 %v3813_v49 }
 0x224   :  { %3333 = vmatprep.subr.bf16.mxu1 %v3889_v5 }
 0x2d9   :  { %v3222_v51 = vpop.f32.mrb[4].mxu0  ;;  %v3244_v52 = vpop.f32.mrb[4].mxu1 }
 0x2da   :  { %v3223_v54 = vpop.f32.mrb[5].mxu0  ;;  %v3245_v55 = vpop.f32.mrb[5].mxu1 }
 0x2db   :  { %v3224_v56 = vadd.f32 %v3223_v54, %v3222_v51  ;;  %v3246_v57 = vadd.f32 %v3245_v55, %v3244_v52  ;;  %v3225_v58 = vpop.f32.mrb[6].mxu0  ;;  %v3247_v59 = vpop.f32.mrb[6].mxu1  ;;  %v3202_v55 = vld [vmem:[%s4198_s15] ss:$0 sm:$0xff] }
 0x2dc   :  { %v3226_v60 = vpop.f32.mrb[7].mxu0  ;;  %v3248_v61 = vpop.f32.mrb[7].mxu1 }
 0x2dd   :  { %v2330_v62 = vadd.f32 %v3224_v56, %v3142_v53 }
 0x2df   :  { %v2370_v63 = vadd.f32 %v3246_v57, %v2330_v62 }
 0x2e1   :  { %v2375_v0 = vmax.f32 %v2370_v63, 0.0  ;;  %v2441_v2 = vpop.f32.mrb[8].mxu0 }
 0x2e2   :  { %v3283_v3 = vpop.f32.mrb[9].mxu0 }
 0x2e3   :  { %v2376_v1 = vpack.c.bf16 %v2375_v0, %v2375_v0  ;;  %v2444_v4 = vpop.f32.mrb[10].mxu0 }
 0x2e4   :  { %v3284_v7 = vpop.f32.mrb[11].mxu0 }
 0x2e5   :  { %3302 = vmatmul.mubr.bf16.vlgmr.msra.gmra.mrb[8].mxu1 %v2376_v1 }
 0x2e6   :  { %3337 = vmatprep.mubr.msk.bf16.mxu1 %vm3891_vm2, %v3889_v5  ;;  %3334 = vmatpush3.bf16.msra.mxu1 %v3824_v10 }
 0x2e7   :  { %3335 = vmatprep.subr.bf16.mxu1 %v3889_v5 }
 0x2ea   :  { %3336 = vmatpush3.bf16.msra.mxu1 %v3825_v30 }
 0x2eb   :  { %3341 = vmatprep.subr.bf16.mxu1 %v3889_v5 }
 0x3b8   :  { %v2529_v9 = vpop.f32.mrb[8].mxu1 }
 0x3b9   :  { %v2530_v12 = vadd.f32 %v2529_v9, %v2441_v2  ;;  %v3303_v13 = vpop.f32.mrb[9].mxu1 }
 0x3ba   :  { %v2532_v14 = vpop.f32.mrb[10].mxu1 }
 0x3bb   :  { %v2542_v15 = vadd.f32 %v3184_v11, %v2530_v12  ;;  %v3304_v16 = vpop.f32.mrb[11].mxu1 }
 0x3bd   :  { %v2543_v17 = vmax.f32 %v2542_v15, 0.0 }
 0x3bf   :  { %v2544_v19 = vpack.c.bf16 %v2543_v17, %v2543_v17 }
 0x3c1   :  { %3310 = vmatmul.mubr.msk.bf16.vlgmr.msra.gmra.mrb[12].mxu0 %vm2568_vm4, %v2544_v19 }
 0x3c2   :  { %3314 = vmatpush3.bf16.msra.mxu0 %v3816_v18  ;;  %3329 = vmatprep.mubr.msk.bf16.mxu0 %vm3891_vm2, %v3889_v5 }
 0x3c3   :  { %3315 = vmatprep.subr.bf16.mxu0 %v3889_v5 }
 0x3c6   :  { %3316 = vmatpush3.bf16.msra.mxu0 %v3817_v20 }
 0x3c7   :  { %3317 = vmatprep.subr.bf16.mxu0 %v3889_v5 }
 0x3ca   :  { %3318 = vmatpush3.bf16.msra.mxu0 %v3818_v21 }
 0x3cb   :  { %3319 = vmatprep.subr.bf16.mxu0 %v3889_v5 }
 0x3ce   :  { %3320 = vmatpush3.bf16.msra.mxu0 %v3819_v22 }
 0x3cf   :  { %3321 = vmatprep.subr.bf16.mxu0 %v3889_v5 }
 0x3d2   :  { %3322 = vmatpush3.bf16.msra.mxu0 %v3820_v23 }
 0x3d3   :  { %3323 = vmatprep.subr.bf16.mxu0 %v3889_v5 }
 0x3d6   :  { %3324 = vmatpush3.bf16.msra.mxu0 %v3821_v24 }
 0x3d7   :  { %3325 = vmatprep.subr.bf16.mxu0 %v3889_v5 }
 0x3da   :  { %3326 = vmatpush3.bf16.msra.mxu0 %v3822_v26 }
 0x3db   :  { %3327 = vmatprep.subr.bf16.mxu0 %v3889_v5 }
 0x3de   :  { %3328 = vmatpush3.bf16.msra.mxu0 %v3823_v27 }
 0x3e1   :  { %3330 = vmatmul.mubr.bf16.vlgmr.msra.gmra.mrb[16].mxu0 %v2376_v1  ;;  %v2865_v1 = vand.u32 127, %v92_v39 }
 0x3e3   :  { %vm2870_vm5 = vcmp.lt.s32.totalorder %v2865_v1, 6 }
 0x494   :  { %v2606_v31 = vpop.f32.mrb[12].mxu0 }
 0x495   :  { %v3311_v32 = vpop.f32.mrb[13].mxu0  ;;  %v2607_v42 = vadd.f32 %v3185_v50, %v2606_v31 }
 0x496   :  { %v2609_v44 = vpop.f32.mrb[14].mxu0 }
 0x497   :  { %v3312_v33 = vpop.f32.mrb[15].mxu0  ;;  %v2612_v28 = vmax.f32 %v2607_v42, 0.0 }
 0x499   :  { %v2613_v46 = vpack.c.bf16 %v2612_v28, %v2612_v28 }
 0x4b4   :  { %v2719_v34 = vpop.f32.mrb[16].mxu0 }
 0x4b5   :  { %v2720_v35 = vadd.f32 %v3189_v25, %v2719_v34  ;;  %v3331_v36 = vpop.f32.mrb[17].mxu0 }
 0x4b6   :  { %v2722_v37 = vpop.f32.mrb[18].mxu0 }
 0x4b7   :  { %v2725_v38 = vmax.f32 %v2720_v35, 0.0  ;;  %v3332_v40 = vpop.f32.mrb[19].mxu0 }
 0x4b9   :  { %v2726_v43 = vpack.c.bf16 %v2725_v38, %v2725_v38 }
 0x4bb   :  { %3338 = vmatmul.mubr.msk.bf16.vlgmr.msra.gmra.mrb[12].mxu1 %vm2568_vm4, %v2726_v43 }
 0x4bc   :  { %3342 = vmatpush3.bf16.msra.mxu1 %v3826_v41  ;;  %3345 = vmatprep.mubr.msk.bf16.mxu1 %vm3891_vm2, %v3889_v5 }
 0x4bd   :  { %3343 = vmatprep.subr.bf16.mxu1 %v3889_v5 }
 0x4c0   :  { %3344 = vmatpush3.bf16.msra.mxu1 %v3827_v45 }
 0x4c3   :  { %3346 = vmatmul.mubr.msk.bf16.vlgmr.msra.gmra.mrb[16].mxu1 %vm2568_vm4, %v2613_v46 }
 0x58e   :  { %v2787_v47 = vpop.f32.mrb[12].mxu1 }
 0x58f   :  { %v2788_v48 = vadd.f32 %v3198_v29, %v2787_v47  ;;  %v3339_v49 = vpop.f32.mrb[13].mxu1 }
 0x590   :  { %v2790_v51 = vpop.f32.mrb[14].mxu1 }
 0x591   :  { %v2793_v52 = vsub.f32 0.0, %v2788_v48  ;;  %v3340_v53 = vpop.f32.mrb[15].mxu1 }
 0x593   :  { %v2794_v54 = vmul.f32 1.442695, %v2793_v52 }
 0x595   :  { %3828 = vpow2.f32 %v2794_v54 }
 0x596   :  { %v2858_v56 = vpop.f32.mrb[16].mxu1 }
 0x597   :  { %v2859_v57 = vadd.f32 %v3202_v55, %v2858_v56  ;;  %v3347_v5 = vpop.f32.mrb[17].mxu1 }
 0x598   :  { %v2861_v58 = vpop.f32.mrb[18].mxu1 }
 0x599   :  { %v2866_v59 = vmax.f32 %v2859_v57, -20.0  ;;  %v3348_v60 = vpop.f32.mrb[19].mxu1 }
 0x59b   :  { %v2867_v61 = vmin.f32 %v2866_v59, 2.0 }
 0x59d   :  { %v2868_v62 = vmul.f32 1.442695, %v2867_v61 }
 0x59f   :  { %v3829_v63 = vpop.eup %3828  ;;  %3830 = vpow2.f32 %v2868_v62 }
 0x5a0   :  { %v2796_v0 = vadd.f32 1.0, %v3829_v63 }
 0x5a2   :  { %3832 = vrcp.f32 %v2796_v0 }
 0x5a9   :  { %v3831_v2 = vpop.eup %3830 }
 0x5aa   :  { %v2871_v3 = vsel %vm2870_vm5, %v2859_v57, %v3831_v2 }
 0x5ab   :  { %2873 = vst.msk [vmem:[%s4199_s16] sm:$0x3] %vm2872_vm6, %v2871_v3 }
 0x5ac   :  { %v3833_v4 = vpop.eup %3832 }
 0x5ad   :  { %2875 = vrot.lane.b32.xlu0 %v3833_v4, %s3892_s8 }
 0x61f   :  { %v2876_v6 = vpop.permute.xlu0 %2875 }
 0x620   :  { %2879 = vst.msk [vmem:[%s4199_s16] sm:$0x3] %vm2878_vm7, %v2876_v6 }
 0x621   :  { %2884 = vsyncpa [#allocation4], 1 }
 0x622   :  { %2885 = vsyncpa [#allocation6], 1 }

</bundles_post_ra>
